<compile_context>
chip_gen: v6e
topology: v6e:2x2x1
jax: 0.10.0
libtpu: 0.0.40
codegen_flags: <defaults>
</compile_context>

<pallas_src>
import jax
import jax.numpy as jnp
from jax.experimental import pallas as pl
from jax.experimental.pallas import tpu as pltpu

# --- small hyperparameters consistent with the module structure ---
VOCAB_SIZE = 65
VOCAB_PAD = 128          # lane-dense padded LM-head width (>= VOCAB_SIZE, multiple of 128)
BLOCK_SIZE = 16          # max context length (torch `block_size`, scaled-down)
N_EMBD = 32              # torch `n_embd` (scaled-down)
N_HEADS = 2              # torch `n_heads`
N_LAYER = 2              # torch `n_layer`
HEAD_SIZE = N_EMBD // N_HEADS
LN_EPS = 1e-5            # torch.nn.LayerNorm default eps
NEG_INF = -1e30          # additive-mask "minus infinity" (robust, no NaN risk)


# ------------------------------------------------------------------
# Fused Pallas kernel: N_LAYER transformer blocks + LM head, one sequence
# per grid step (grid over batch).
# ------------------------------------------------------------------
def fused_forward_kernel(x_ref,
                         ln1w_ref, ln1b_ref,
                         wqkv_ref, wo_ref, bo_ref,
                         ln2w_ref, ln2b_ref,
                         w1_ref, b1_ref, w2_ref, b2_ref,
                         head_w_ref, head_b_ref,
                         out_ref):
    x = x_ref[0]                                    # (T, C), float32
    T, C = x.shape

    # Causal additive (T, T) mask: 0 where allowed, -1e30 elsewhere.
    # Built once per grid step; O(T^2) only (the per-batch restructure removed
    # the old O((B*T)^2) mask).
    row = jax.lax.broadcasted_iota(jnp.int32, (T, T), 0)
    col = jax.lax.broadcasted_iota(jnp.int32, (T, T), 1)
    mask_add = jnp.where(col <= row, 0.0, NEG_INF).astype(jnp.float32)

    def layer_norm(v, w, b):                        # f32 VPU path
        mu = jnp.mean(v, axis=-1, keepdims=True)
        var = jnp.mean((v - mu) ** 2, axis=-1, keepdims=True)
        return (v - mu) * jax.lax.rsqrt(var + LN_EPS) * w + b

    for l in range(N_LAYER):                        # static, unrolled layer loop
        # ---------------- self-attention branch ----------------
        h = layer_norm(x, ln1w_ref[l], ln1b_ref[l])                    # (T, C) f32
        # packed QKV: bf16 x bf16 on the MXU, f32 accumulate.
        qkv = jnp.dot(h.astype(jnp.bfloat16), wqkv_ref[l],
                      preferred_element_type=jnp.float32)              # (T, 3C) f32
        qkv_bf = qkv.astype(jnp.bfloat16)
        wo_l = wo_ref[l]                                               # (C, C) bf16

        sa = None
        for hh in range(N_HEADS):                   # static loop over heads
            q = qkv_bf[:, hh * HEAD_SIZE:(hh + 1) * HEAD_SIZE]
            k = qkv_bf[:, C + hh * HEAD_SIZE:C + (hh + 1) * HEAD_SIZE]
            v = qkv_bf[:, 2 * C + hh * HEAD_SIZE:2 * C + (hh + 1) * HEAD_SIZE]

            # (T, T) scores; no explicit k transpose (contract on dim 1 of both).
            # The reference's C**-0.5 (C == n_embd) scale is folded into the
            # q-weights at init, so no per-score multiply here.
            wei = jax.lax.dot_general(
                q, k, dimension_numbers=(((1,), (1,)), ((), ())),
                preferred_element_type=jnp.float32)
            wei = wei + mask_add                    # masked_fill(tril==0, -inf) equivalent
            wei = wei - jnp.max(wei, axis=-1, keepdims=True)
            p = jnp.exp(wei)
            p = p * pl.reciprocal(jnp.sum(p, axis=-1, keepdims=True), approx=True)
            # attention-weight dropout is identity at inference
            att_h = jnp.dot(p.astype(jnp.bfloat16), v,
                            preferred_element_type=jnp.float32)        # (T, hs)
            # accumulate per-head output projection (no lane concat):
            #   sa = sum_h att_h @ wo[h*hs:(h+1)*hs, :]
            contrib = jnp.dot(att_h.astype(jnp.bfloat16),
                              wo_l[hh * HEAD_SIZE:(hh + 1) * HEAD_SIZE, :],
                              preferred_element_type=jnp.float32)
            sa = contrib if sa is None else sa + contrib

        x = x + sa + bo_ref[l]                                         # residual + proj bias

        # ---------------- feed-forward branch ----------------
        g = layer_norm(x, ln2w_ref[l], ln2b_ref[l])
        ff = jnp.dot(g.astype(jnp.bfloat16), w1_ref[l],
                     preferred_element_type=jnp.float32) + b1_ref[l]
        ff = jnp.maximum(ff, 0.0)                                      # ReLU
        ff = jnp.dot(ff.astype(jnp.bfloat16), w2_ref[l],
                     preferred_element_type=jnp.float32) + b2_ref[l]
        # FFN dropout is identity at inference
        x = x + ff                                                     # residual

    # ---------------- LM head (lane-dense padded output) ----------------
    logits = jnp.dot(x.astype(jnp.bfloat16), head_w_ref[...],
                     preferred_element_type=jnp.float32) + head_b_ref[...]
    out_ref[0] = logits


# ------------------------------------------------------------------
# Wrapper: one pallas_call, gridded over batch; weights use constant
# index_maps so they stay VMEM-resident across grid steps.
# ------------------------------------------------------------------
def run_fused_forward(x3d, params):
    B, T, C = x3d.shape
    const3 = lambda b: (0, 0, 0)
    const2 = lambda b: (0, 0)

    in_specs = [
        pl.BlockSpec((1, T, C), lambda b: (b, 0, 0)),            # x (one sequence / step)
        pl.BlockSpec((N_LAYER, 1, C), const3),                   # ln1_w
        pl.BlockSpec((N_LAYER, 1, C), const3),                   # ln1_b
        pl.BlockSpec((N_LAYER, C, 3 * C), const3),               # wqkv (bf16)
        pl.BlockSpec((N_LAYER, C, C), const3),                   # wo   (bf16)
        pl.BlockSpec((N_LAYER, 1, C), const3),                   # bo
        pl.BlockSpec((N_LAYER, 1, C), const3),                   # ln2_w
        pl.BlockSpec((N_LAYER, 1, C), const3),                   # ln2_b
        pl.BlockSpec((N_LAYER, C, 4 * C), const3),               # w1   (bf16)
        pl.BlockSpec((N_LAYER, 1, 4 * C), const3),               # b1
        pl.BlockSpec((N_LAYER, 4 * C, C), const3),               # w2   (bf16)
        pl.BlockSpec((N_LAYER, 1, C), const3),                   # b2
        pl.BlockSpec((C, VOCAB_PAD), const2),                    # head_w (bf16)
        pl.BlockSpec((1, VOCAB_PAD), const2),                    # head_b
    ]

    args = (x3d,
            params['ln1_w'], params['ln1_b'],
            params['wqkv'], params['wo'], params['bo'],
            params['ln2_w'], params['ln2_b'],
            params['w1'], params['b1'], params['w2'], params['b2'],
            params['head_w'], params['head_b'])

    # TODO(synk): for very small T and large B, group several batch elements per
    # grid step (row tiles of 256+ B*T rows) to further amortize per-step overhead.
    return pl.pallas_call(
        fused_forward_kernel,
        out_shape=jax.ShapeDtypeStruct((B, T, VOCAB_PAD), jnp.float32),
        grid=(B,),
        in_specs=in_specs,
        out_specs=pl.BlockSpec((1, T, VOCAB_PAD), lambda b: (b, 0, 0)),
        compiler_params=pltpu.CompilerParams(
            dimension_semantics=("parallel",),          # megacore batch split on v7x
            vmem_limit_bytes=48 * 1024 * 1024),         # headroom-safe on v7x's 64 MiB
    )(*args)


# ------------------------------------------------------------------
# Parameters (deterministic synthetic init) and full forward
# ------------------------------------------------------------------
def init_params(key):
    keys = iter(jax.random.split(key, 16))

    def nrm(shape, scale=0.02):
        return scale * jax.random.normal(next(keys), shape, dtype=jnp.float32)

    # packed QKV: [q_heads | k_heads | v_heads], each C wide (heads concatenated)
    wqkv = nrm((N_LAYER, N_EMBD, 3 * N_EMBD))
    # fold the reference's C**-0.5 attention scale (C == n_embd) into the q-weights
    wqkv = wqkv.at[:, :, :N_EMBD].multiply(float(N_EMBD) ** (-0.5))

    hw = nrm((N_EMBD, VOCAB_SIZE))
    hb = nrm((1, VOCAB_SIZE))
    head_w = jnp.zeros((N_EMBD, VOCAB_PAD), jnp.float32).at[:, :VOCAB_SIZE].set(hw)
    head_b = jnp.zeros((1, VOCAB_PAD), jnp.float32).at[:, :VOCAB_SIZE].set(hb)

    params = {
        'tok_emb': nrm((VOCAB_SIZE, N_EMBD)),
        'pos_emb': nrm((BLOCK_SIZE, N_EMBD)),
        # per-layer weights stacked along leading N_LAYER axis.
        # matmul weights -> bf16 (native MXU); LN weights & biases stay f32 (VPU path).
        'ln1_w': jnp.ones((N_LAYER, 1, N_EMBD), jnp.float32),
        'ln1_b': jnp.zeros((N_LAYER, 1, N_EMBD), jnp.float32),
        'wqkv': wqkv.astype(jnp.bfloat16),
        'wo': nrm((N_LAYER, N_EMBD, N_EMBD)).astype(jnp.bfloat16),
        'bo': nrm((N_LAYER, 1, N_EMBD)),
        'ln2_w': jnp.ones((N_LAYER, 1, N_EMBD), jnp.float32),
        'ln2_b': jnp.zeros((N_LAYER, 1, N_EMBD), jnp.float32),
        'w1': nrm((N_LAYER, N_EMBD, 4 * N_EMBD)).astype(jnp.bfloat16),
        'b1': nrm((N_LAYER, 1, 4 * N_EMBD)),
        'w2': nrm((N_LAYER, 4 * N_EMBD, N_EMBD)).astype(jnp.bfloat16),
        'b2': nrm((N_LAYER, 1, N_EMBD)),
        'head_w': head_w.astype(jnp.bfloat16),
        'head_b': head_b,
    }
    return params


@jax.jit
def bigram_lm_forward(idx, params):
    """forward(idx, target=None) -> (logits, None)."""
    B, T = idx.shape
    # Embedding gathers are glue (plain JAX); the hot path is one fused Pallas kernel.
    tok_embd = jnp.take(params['tok_emb'], idx, axis=0)        # (B, T, C)
    pos_embd = params['pos_emb'][:T]                           # (T, C)
    x3d = tok_embd + pos_embd[None, :, :]                      # (B, T, C) f32
    logits_pad = run_fused_forward(x3d, params)                # (B, T, 128)
    logits = logits_pad[:, :, :VOCAB_SIZE]
    loss = None   # target is None in this forward
    return logits, loss


if __name__ == "__main__":
    key = jax.random.PRNGKey(0)
    k_params, k_idx = jax.random.split(key)

    params = init_params(k_params)

    B, T = 2, 8
    idx = jax.random.randint(k_idx, (B, T), 0, VOCAB_SIZE, dtype=jnp.int32)

    logits, loss = bigram_lm_forward(idx, params)
    logits = jax.block_until_ready(logits)

    assert logits.shape == (B, T, VOCAB_SIZE), logits.shape
    assert logits.dtype == jnp.float32
    assert bool(jnp.all(jnp.isfinite(logits)))
    assert loss is None
    print("KERNEL_OK")
</pallas_src>

<mosaic_0001>
module attributes {stable_mosaic.version = 11 : i64} {
  func.func @fused_forward_kernel(%arg0: i32, %arg1: memref<1x8x32xf32, #tpu.memory_space<vmem>>, %arg2: memref<2x1x32xf32, #tpu.memory_space<vmem>>, %arg3: memref<2x1x32xf32, #tpu.memory_space<vmem>>, %arg4: memref<2x32x96xbf16, #tpu.memory_space<vmem>>, %arg5: memref<2x32x32xbf16, #tpu.memory_space<vmem>>, %arg6: memref<2x1x32xf32, #tpu.memory_space<vmem>>, %arg7: memref<2x1x32xf32, #tpu.memory_space<vmem>>, %arg8: memref<2x1x32xf32, #tpu.memory_space<vmem>>, %arg9: memref<2x32x128xbf16, #tpu.memory_space<vmem>>, %arg10: memref<2x1x128xf32, #tpu.memory_space<vmem>>, %arg11: memref<2x128x32xbf16, #tpu.memory_space<vmem>>, %arg12: memref<2x1x32xf32, #tpu.memory_space<vmem>>, %arg13: memref<32x128xbf16, #tpu.memory_space<vmem>>, %arg14: memref<1x128xf32, #tpu.memory_space<vmem>>, %arg15: memref<1x8x128xf32, #tpu.memory_space<vmem>>) attributes {dimension_semantics = [#tpu.dimension_semantics<parallel>], iteration_bounds = array<i64: 2>, scalar_prefetch = 0 : i64, scratch_operands = 0 : i64, tpu.core_type = #tpu.core_type<tc>, window_params = [{transform_indices = @transform_0, window_bounds = array<i64: 1, 8, 32>}, {pipeline_mode = #tpu.pipeline_mode<synchronous>, transform_indices = @transform_1, window_bounds = array<i64: 2, 1, 32>}, {pipeline_mode = #tpu.pipeline_mode<synchronous>, transform_indices = @transform_2, window_bounds = array<i64: 2, 1, 32>}, {pipeline_mode = #tpu.pipeline_mode<synchronous>, transform_indices = @transform_3, window_bounds = array<i64: 2, 32, 96>}, {pipeline_mode = #tpu.pipeline_mode<synchronous>, transform_indices = @transform_4, window_bounds = array<i64: 2, 32, 32>}, {pipeline_mode = #tpu.pipeline_mode<synchronous>, transform_indices = @transform_5, window_bounds = array<i64: 2, 1, 32>}, {pipeline_mode = #tpu.pipeline_mode<synchronous>, transform_indices = @transform_6, window_bounds = array<i64: 2, 1, 32>}, {pipeline_mode = #tpu.pipeline_mode<synchronous>, transform_indices = @transform_7, window_bounds = array<i64: 2, 1, 32>}, {pipeline_mode = #tpu.pipeline_mode<synchronous>, transform_indices = @transform_8, window_bounds = array<i64: 2, 32, 128>}, {pipeline_mode = #tpu.pipeline_mode<synchronous>, transform_indices = @transform_9, window_bounds = array<i64: 2, 1, 128>}, {pipeline_mode = #tpu.pipeline_mode<synchronous>, transform_indices = @transform_10, window_bounds = array<i64: 2, 128, 32>}, {pipeline_mode = #tpu.pipeline_mode<synchronous>, transform_indices = @transform_11, window_bounds = array<i64: 2, 1, 32>}, {pipeline_mode = #tpu.pipeline_mode<synchronous>, transform_indices = @transform_12, window_bounds = array<i64: 32, 128>}, {pipeline_mode = #tpu.pipeline_mode<synchronous>, transform_indices = @transform_13, window_bounds = array<i64: 1, 128>}, {transform_indices = @transform_14, window_bounds = array<i64: 1, 8, 128>}]} {
    %c0 = arith.constant 0 : index
    %c0_0 = arith.constant 0 : index
    %c0_1 = arith.constant 0 : index
    %0 = vector.load %arg1[%c0, %c0_0, %c0_1] : memref<1x8x32xf32, #tpu.memory_space<vmem>>, vector<1x8x32xf32>
    %1 = vector.shape_cast %0 : vector<1x8x32xf32> to vector<8x32xf32>
    %2 = tpu.iota {dimensions = array<i32: 0>} : vector<8x8xi32>
    %3 = tpu.iota {dimensions = array<i32: 1>} : vector<8x8xi32>
    %4 = arith.cmpi sle, %3, %2 : vector<8x8xi32>
    %cst = arith.constant 0.000000e+00 : f32
    %cst_2 = arith.constant -1.000000e+30 : f32
    %5 = vector.broadcast %cst : f32 to vector<8x8xf32>
    %6 = vector.broadcast %cst_2 : f32 to vector<8x8xf32>
    %7 = arith.select %4, %5, %6 : vector<8x8xi1>, vector<8x8xf32>
    %c0_3 = arith.constant 0 : index
    %c0_4 = arith.constant 0 : index
    %c0_5 = arith.constant 0 : index
    %8 = vector.load %arg2[%c0_3, %c0_4, %c0_5] : memref<2x1x32xf32, #tpu.memory_space<vmem>>, vector<1x1x32xf32>
    %9 = vector.shape_cast %8 : vector<1x1x32xf32> to vector<1x32xf32>
    %c0_6 = arith.constant 0 : index
    %c0_7 = arith.constant 0 : index
    %c0_8 = arith.constant 0 : index
    %10 = vector.load %arg3[%c0_6, %c0_7, %c0_8] : memref<2x1x32xf32, #tpu.memory_space<vmem>>, vector<1x1x32xf32>
    %11 = vector.shape_cast %10 : vector<1x1x32xf32> to vector<1x32xf32>
    %cst_9 = arith.constant dense<0.000000e+00> : vector<8xf32>
    %12 = vector.multi_reduction <add>, %1, %cst_9 [1] : vector<8x32xf32> to vector<8xf32>
    %13 = vector.shape_cast %12 : vector<8xf32> to vector<8x1xf32>
    %cst_10 = arith.constant 3.200000e+01 : f32
    %14 = vector.broadcast %cst_10 : f32 to vector<8x1xf32>
    %15 = arith.divf %13, %14 : vector<8x1xf32>
    %16 = vector.broadcast %15 : vector<8x1xf32> to vector<8x32xf32>
    %17 = arith.subf %1, %16 : vector<8x32xf32>
    %18 = arith.mulf %17, %17 : vector<8x32xf32>
    %cst_11 = arith.constant dense<0.000000e+00> : vector<8xf32>
    %19 = vector.multi_reduction <add>, %18, %cst_11 [1] : vector<8x32xf32> to vector<8xf32>
    %20 = vector.shape_cast %19 : vector<8xf32> to vector<8x1xf32>
    %cst_12 = arith.constant 3.200000e+01 : f32
    %21 = vector.broadcast %cst_12 : f32 to vector<8x1xf32>
    %22 = arith.divf %20, %21 : vector<8x1xf32>
    %23 = vector.broadcast %15 : vector<8x1xf32> to vector<8x32xf32>
    %24 = arith.subf %1, %23 : vector<8x32xf32>
    %cst_13 = arith.constant 9.99999974E-6 : f32
    %25 = vector.broadcast %cst_13 : f32 to vector<8x1xf32>
    %26 = arith.addf %22, %25 : vector<8x1xf32>
    %27 = math.rsqrt %26 : vector<8x1xf32>
    %28 = vector.broadcast %27 : vector<8x1xf32> to vector<8x32xf32>
    %29 = arith.mulf %24, %28 : vector<8x32xf32>
    %30 = vector.broadcast %9 : vector<1x32xf32> to vector<8x32xf32>
    %31 = arith.mulf %29, %30 : vector<8x32xf32>
    %32 = vector.broadcast %11 : vector<1x32xf32> to vector<8x32xf32>
    %33 = arith.addf %31, %32 : vector<8x32xf32>
    %34 = arith.truncf %33 : vector<8x32xf32> to vector<8x32xbf16>
    %c0_14 = arith.constant 0 : index
    %c0_15 = arith.constant 0 : index
    %c0_16 = arith.constant 0 : index
    %35 = vector.load %arg4[%c0_14, %c0_15, %c0_16] : memref<2x32x96xbf16, #tpu.memory_space<vmem>>, vector<1x32x96xbf16>
    %36 = vector.shape_cast %35 : vector<1x32x96xbf16> to vector<32x96xbf16>
    %cst_17 = arith.constant dense<0.000000e+00> : vector<8x96xf32>
    %37 = tpu.matmul %34, %36, %cst_17 {dimension_numbers = #tpu.dot_dimension_numbers<[1], [0], [0], [1], [0, 0, 1, 1], [], []>} : vector<8x32xbf16>, vector<32x96xbf16>, vector<8x96xf32> -> vector<8x96xf32>
    %38 = arith.truncf %37 : vector<8x96xf32> to vector<8x96xbf16>
    %c0_18 = arith.constant 0 : index
    %c0_19 = arith.constant 0 : index
    %c0_20 = arith.constant 0 : index
    %39 = vector.load %arg5[%c0_18, %c0_19, %c0_20] : memref<2x32x32xbf16, #tpu.memory_space<vmem>>, vector<1x32x32xbf16>
    %40 = vector.shape_cast %39 : vector<1x32x32xbf16> to vector<32x32xbf16>
    %41 = vector.extract_strided_slice %38 {offsets = [0, 0], sizes = [8, 16], strides = [1, 1]} : vector<8x96xbf16> to vector<8x16xbf16>
    %42 = vector.extract_strided_slice %38 {offsets = [0, 32], sizes = [8, 16], strides = [1, 1]} : vector<8x96xbf16> to vector<8x16xbf16>
    %43 = vector.extract_strided_slice %38 {offsets = [0, 64], sizes = [8, 16], strides = [1, 1]} : vector<8x96xbf16> to vector<8x16xbf16>
    %cst_21 = arith.constant dense<0.000000e+00> : vector<8x8xf32>
    %44 = tpu.matmul %41, %42, %cst_21 {dimension_numbers = #tpu.dot_dimension_numbers<[1], [1], [0], [0], [0, 0, 1, 0], [], []>} : vector<8x16xbf16>, vector<8x16xbf16>, vector<8x8xf32> -> vector<8x8xf32>
    %45 = arith.addf %44, %7 : vector<8x8xf32>
    %cst_22 = arith.constant dense<0xFF800000> : vector<8xf32>
    %46 = vector.multi_reduction <maximumf>, %45, %cst_22 [1] : vector<8x8xf32> to vector<8xf32>
    %47 = vector.shape_cast %46 : vector<8xf32> to vector<8x1xf32>
    %48 = vector.broadcast %47 : vector<8x1xf32> to vector<8x8xf32>
    %49 = arith.subf %45, %48 : vector<8x8xf32>
    %50 = math.exp %49 : vector<8x8xf32>
    %cst_23 = arith.constant dense<0.000000e+00> : vector<8xf32>
    %51 = vector.multi_reduction <add>, %50, %cst_23 [1] : vector<8x8xf32> to vector<8xf32>
    %52 = vector.shape_cast %51 : vector<8xf32> to vector<8x1xf32>
    %53 = tpu.reciprocal %52 {approx = true} : vector<8x1xf32> -> vector<8x1xf32>
    %54 = vector.broadcast %53 : vector<8x1xf32> to vector<8x8xf32>
    %55 = arith.mulf %50, %54 : vector<8x8xf32>
    %56 = arith.truncf %55 : vector<8x8xf32> to vector<8x8xbf16>
    %cst_24 = arith.constant dense<0.000000e+00> : vector<8x16xf32>
    %57 = tpu.matmul %56, %43, %cst_24 {dimension_numbers = #tpu.dot_dimension_numbers<[1], [0], [0], [1], [0, 0, 1, 1], [], []>} : vector<8x8xbf16>, vector<8x16xbf16>, vector<8x16xf32> -> vector<8x16xf32>
    %58 = arith.truncf %57 : vector<8x16xf32> to vector<8x16xbf16>
    %59 = vector.extract_strided_slice %40 {offsets = [0, 0], sizes = [16, 32], strides = [1, 1]} : vector<32x32xbf16> to vector<16x32xbf16>
    %cst_25 = arith.constant dense<0.000000e+00> : vector<8x32xf32>
    %60 = tpu.matmul %58, %59, %cst_25 {dimension_numbers = #tpu.dot_dimension_numbers<[1], [0], [0], [1], [0, 0, 1, 1], [], []>} : vector<8x16xbf16>, vector<16x32xbf16>, vector<8x32xf32> -> vector<8x32xf32>
    %61 = vector.extract_strided_slice %38 {offsets = [0, 16], sizes = [8, 16], strides = [1, 1]} : vector<8x96xbf16> to vector<8x16xbf16>
    %62 = vector.extract_strided_slice %38 {offsets = [0, 48], sizes = [8, 16], strides = [1, 1]} : vector<8x96xbf16> to vector<8x16xbf16>
    %63 = vector.extract_strided_slice %38 {offsets = [0, 80], sizes = [8, 16], strides = [1, 1]} : vector<8x96xbf16> to vector<8x16xbf16>
    %cst_26 = arith.constant dense<0.000000e+00> : vector<8x8xf32>
    %64 = tpu.matmul %61, %62, %cst_26 {dimension_numbers = #tpu.dot_dimension_numbers<[1], [1], [0], [0], [0, 0, 1, 0], [], []>} : vector<8x16xbf16>, vector<8x16xbf16>, vector<8x8xf32> -> vector<8x8xf32>
    %65 = arith.addf %64, %7 : vector<8x8xf32>
    %cst_27 = arith.constant dense<0xFF800000> : vector<8xf32>
    %66 = vector.multi_reduction <maximumf>, %65, %cst_27 [1] : vector<8x8xf32> to vector<8xf32>
    %67 = vector.shape_cast %66 : vector<8xf32> to vector<8x1xf32>
    %68 = vector.broadcast %67 : vector<8x1xf32> to vector<8x8xf32>
    %69 = arith.subf %65, %68 : vector<8x8xf32>
    %70 = math.exp %69 : vector<8x8xf32>
    %cst_28 = arith.constant dense<0.000000e+00> : vector<8xf32>
    %71 = vector.multi_reduction <add>, %70, %cst_28 [1] : vector<8x8xf32> to vector<8xf32>
    %72 = vector.shape_cast %71 : vector<8xf32> to vector<8x1xf32>
    %73 = tpu.reciprocal %72 {approx = true} : vector<8x1xf32> -> vector<8x1xf32>
    %74 = vector.broadcast %73 : vector<8x1xf32> to vector<8x8xf32>
    %75 = arith.mulf %70, %74 : vector<8x8xf32>
    %76 = arith.truncf %75 : vector<8x8xf32> to vector<8x8xbf16>
    %cst_29 = arith.constant dense<0.000000e+00> : vector<8x16xf32>
    %77 = tpu.matmul %76, %63, %cst_29 {dimension_numbers = #tpu.dot_dimension_numbers<[1], [0], [0], [1], [0, 0, 1, 1], [], []>} : vector<8x8xbf16>, vector<8x16xbf16>, vector<8x16xf32> -> vector<8x16xf32>
    %78 = arith.truncf %77 : vector<8x16xf32> to vector<8x16xbf16>
    %79 = vector.extract_strided_slice %40 {offsets = [16, 0], sizes = [16, 32], strides = [1, 1]} : vector<32x32xbf16> to vector<16x32xbf16>
    %cst_30 = arith.constant dense<0.000000e+00> : vector<8x32xf32>
    %80 = tpu.matmul %78, %79, %cst_30 {dimension_numbers = #tpu.dot_dimension_numbers<[1], [0], [0], [1], [0, 0, 1, 1], [], []>} : vector<8x16xbf16>, vector<16x32xbf16>, vector<8x32xf32> -> vector<8x32xf32>
    %81 = arith.addf %60, %80 : vector<8x32xf32>
    %82 = arith.addf %1, %81 : vector<8x32xf32>
    %c0_31 = arith.constant 0 : index
    %c0_32 = arith.constant 0 : index
    %c0_33 = arith.constant 0 : index
    %83 = vector.load %arg6[%c0_31, %c0_32, %c0_33] : memref<2x1x32xf32, #tpu.memory_space<vmem>>, vector<1x1x32xf32>
    %84 = vector.shape_cast %83 : vector<1x1x32xf32> to vector<1x32xf32>
    %85 = vector.broadcast %84 : vector<1x32xf32> to vector<8x32xf32>
    %86 = arith.addf %82, %85 : vector<8x32xf32>
    %c0_34 = arith.constant 0 : index
    %c0_35 = arith.constant 0 : index
    %c0_36 = arith.constant 0 : index
    %87 = vector.load %arg7[%c0_34, %c0_35, %c0_36] : memref<2x1x32xf32, #tpu.memory_space<vmem>>, vector<1x1x32xf32>
    %88 = vector.shape_cast %87 : vector<1x1x32xf32> to vector<1x32xf32>
    %c0_37 = arith.constant 0 : index
    %c0_38 = arith.constant 0 : index
    %c0_39 = arith.constant 0 : index
    %89 = vector.load %arg8[%c0_37, %c0_38, %c0_39] : memref<2x1x32xf32, #tpu.memory_space<vmem>>, vector<1x1x32xf32>
    %90 = vector.shape_cast %89 : vector<1x1x32xf32> to vector<1x32xf32>
    %cst_40 = arith.constant dense<0.000000e+00> : vector<8xf32>
    %91 = vector.multi_reduction <add>, %86, %cst_40 [1] : vector<8x32xf32> to vector<8xf32>
    %92 = vector.shape_cast %91 : vector<8xf32> to vector<8x1xf32>
    %cst_41 = arith.constant 3.200000e+01 : f32
    %93 = vector.broadcast %cst_41 : f32 to vector<8x1xf32>
    %94 = arith.divf %92, %93 : vector<8x1xf32>
    %95 = vector.broadcast %94 : vector<8x1xf32> to vector<8x32xf32>
    %96 = arith.subf %86, %95 : vector<8x32xf32>
    %97 = arith.mulf %96, %96 : vector<8x32xf32>
    %cst_42 = arith.constant dense<0.000000e+00> : vector<8xf32>
    %98 = vector.multi_reduction <add>, %97, %cst_42 [1] : vector<8x32xf32> to vector<8xf32>
    %99 = vector.shape_cast %98 : vector<8xf32> to vector<8x1xf32>
    %cst_43 = arith.constant 3.200000e+01 : f32
    %100 = vector.broadcast %cst_43 : f32 to vector<8x1xf32>
    %101 = arith.divf %99, %100 : vector<8x1xf32>
    %102 = vector.broadcast %94 : vector<8x1xf32> to vector<8x32xf32>
    %103 = arith.subf %86, %102 : vector<8x32xf32>
    %cst_44 = arith.constant 9.99999974E-6 : f32
    %104 = vector.broadcast %cst_44 : f32 to vector<8x1xf32>
    %105 = arith.addf %101, %104 : vector<8x1xf32>
    %106 = math.rsqrt %105 : vector<8x1xf32>
    %107 = vector.broadcast %106 : vector<8x1xf32> to vector<8x32xf32>
    %108 = arith.mulf %103, %107 : vector<8x32xf32>
    %109 = vector.broadcast %88 : vector<1x32xf32> to vector<8x32xf32>
    %110 = arith.mulf %108, %109 : vector<8x32xf32>
    %111 = vector.broadcast %90 : vector<1x32xf32> to vector<8x32xf32>
    %112 = arith.addf %110, %111 : vector<8x32xf32>
    %113 = arith.truncf %112 : vector<8x32xf32> to vector<8x32xbf16>
    %c0_45 = arith.constant 0 : index
    %c0_46 = arith.constant 0 : index
    %c0_47 = arith.constant 0 : index
    %114 = vector.load %arg9[%c0_45, %c0_46, %c0_47] : memref<2x32x128xbf16, #tpu.memory_space<vmem>>, vector<1x32x128xbf16>
    %115 = vector.shape_cast %114 : vector<1x32x128xbf16> to vector<32x128xbf16>
    %cst_48 = arith.constant dense<0.000000e+00> : vector<8x128xf32>
    %116 = tpu.matmul %113, %115, %cst_48 {dimension_numbers = #tpu.dot_dimension_numbers<[1], [0], [0], [1], [0, 0, 1, 1], [], []>} : vector<8x32xbf16>, vector<32x128xbf16>, vector<8x128xf32> -> vector<8x128xf32>
    %c0_49 = arith.constant 0 : index
    %c0_50 = arith.constant 0 : index
    %c0_51 = arith.constant 0 : index
    %117 = vector.load %arg10[%c0_49, %c0_50, %c0_51] : memref<2x1x128xf32, #tpu.memory_space<vmem>>, vector<1x1x128xf32>
    %118 = vector.shape_cast %117 : vector<1x1x128xf32> to vector<1x128xf32>
    %119 = vector.broadcast %118 : vector<1x128xf32> to vector<8x128xf32>
    %120 = arith.addf %116, %119 : vector<8x128xf32>
    %cst_52 = arith.constant 0.000000e+00 : f32
    %121 = vector.broadcast %cst_52 : f32 to vector<8x128xf32>
    %122 = arith.maximumf %120, %121 : vector<8x128xf32>
    %123 = arith.truncf %122 : vector<8x128xf32> to vector<8x128xbf16>
    %c0_53 = arith.constant 0 : index
    %c0_54 = arith.constant 0 : index
    %c0_55 = arith.constant 0 : index
    %124 = vector.load %arg11[%c0_53, %c0_54, %c0_55] : memref<2x128x32xbf16, #tpu.memory_space<vmem>>, vector<1x128x32xbf16>
    %125 = vector.shape_cast %124 : vector<1x128x32xbf16> to vector<128x32xbf16>
    %cst_56 = arith.constant dense<0.000000e+00> : vector<8x32xf32>
    %126 = tpu.matmul %123, %125, %cst_56 {dimension_numbers = #tpu.dot_dimension_numbers<[1], [0], [0], [1], [0, 0, 1, 1], [], []>} : vector<8x128xbf16>, vector<128x32xbf16>, vector<8x32xf32> -> vector<8x32xf32>
    %c0_57 = arith.constant 0 : index
    %c0_58 = arith.constant 0 : index
    %c0_59 = arith.constant 0 : index
    %127 = vector.load %arg12[%c0_57, %c0_58, %c0_59] : memref<2x1x32xf32, #tpu.memory_space<vmem>>, vector<1x1x32xf32>
    %128 = vector.shape_cast %127 : vector<1x1x32xf32> to vector<1x32xf32>
    %129 = vector.broadcast %128 : vector<1x32xf32> to vector<8x32xf32>
    %130 = arith.addf %126, %129 : vector<8x32xf32>
    %131 = arith.addf %86, %130 : vector<8x32xf32>
    %c1 = arith.constant 1 : index
    %c0_60 = arith.constant 0 : index
    %c0_61 = arith.constant 0 : index
    %132 = vector.load %arg2[%c1, %c0_60, %c0_61] : memref<2x1x32xf32, #tpu.memory_space<vmem>>, vector<1x1x32xf32>
    %133 = vector.shape_cast %132 : vector<1x1x32xf32> to vector<1x32xf32>
    %c1_62 = arith.constant 1 : index
    %c0_63 = arith.constant 0 : index
    %c0_64 = arith.constant 0 : index
    %134 = vector.load %arg3[%c1_62, %c0_63, %c0_64] : memref<2x1x32xf32, #tpu.memory_space<vmem>>, vector<1x1x32xf32>
    %135 = vector.shape_cast %134 : vector<1x1x32xf32> to vector<1x32xf32>
    %cst_65 = arith.constant dense<0.000000e+00> : vector<8xf32>
    %136 = vector.multi_reduction <add>, %131, %cst_65 [1] : vector<8x32xf32> to vector<8xf32>
    %137 = vector.shape_cast %136 : vector<8xf32> to vector<8x1xf32>
    %cst_66 = arith.constant 3.200000e+01 : f32
    %138 = vector.broadcast %cst_66 : f32 to vector<8x1xf32>
    %139 = arith.divf %137, %138 : vector<8x1xf32>
    %140 = vector.broadcast %139 : vector<8x1xf32> to vector<8x32xf32>
    %141 = arith.subf %131, %140 : vector<8x32xf32>
    %142 = arith.mulf %141, %141 : vector<8x32xf32>
    %cst_67 = arith.constant dense<0.000000e+00> : vector<8xf32>
    %143 = vector.multi_reduction <add>, %142, %cst_67 [1] : vector<8x32xf32> to vector<8xf32>
    %144 = vector.shape_cast %143 : vector<8xf32> to vector<8x1xf32>
    %cst_68 = arith.constant 3.200000e+01 : f32
    %145 = vector.broadcast %cst_68 : f32 to vector<8x1xf32>
    %146 = arith.divf %144, %145 : vector<8x1xf32>
    %147 = vector.broadcast %139 : vector<8x1xf32> to vector<8x32xf32>
    %148 = arith.subf %131, %147 : vector<8x32xf32>
    %cst_69 = arith.constant 9.99999974E-6 : f32
    %149 = vector.broadcast %cst_69 : f32 to vector<8x1xf32>
    %150 = arith.addf %146, %149 : vector<8x1xf32>
    %151 = math.rsqrt %150 : vector<8x1xf32>
    %152 = vector.broadcast %151 : vector<8x1xf32> to vector<8x32xf32>
    %153 = arith.mulf %148, %152 : vector<8x32xf32>
    %154 = vector.broadcast %133 : vector<1x32xf32> to vector<8x32xf32>
    %155 = arith.mulf %153, %154 : vector<8x32xf32>
    %156 = vector.broadcast %135 : vector<1x32xf32> to vector<8x32xf32>
    %157 = arith.addf %155, %156 : vector<8x32xf32>
    %158 = arith.truncf %157 : vector<8x32xf32> to vector<8x32xbf16>
    %c1_70 = arith.constant 1 : index
    %c0_71 = arith.constant 0 : index
    %c0_72 = arith.constant 0 : index
    %159 = vector.load %arg4[%c1_70, %c0_71, %c0_72] : memref<2x32x96xbf16, #tpu.memory_space<vmem>>, vector<1x32x96xbf16>
    %160 = vector.shape_cast %159 : vector<1x32x96xbf16> to vector<32x96xbf16>
    %cst_73 = arith.constant dense<0.000000e+00> : vector<8x96xf32>
    %161 = tpu.matmul %158, %160, %cst_73 {dimension_numbers = #tpu.dot_dimension_numbers<[1], [0], [0], [1], [0, 0, 1, 1], [], []>} : vector<8x32xbf16>, vector<32x96xbf16>, vector<8x96xf32> -> vector<8x96xf32>
    %162 = arith.truncf %161 : vector<8x96xf32> to vector<8x96xbf16>
    %c1_74 = arith.constant 1 : index
    %c0_75 = arith.constant 0 : index
    %c0_76 = arith.constant 0 : index
    %163 = vector.load %arg5[%c1_74, %c0_75, %c0_76] : memref<2x32x32xbf16, #tpu.memory_space<vmem>>, vector<1x32x32xbf16>
    %164 = vector.shape_cast %163 : vector<1x32x32xbf16> to vector<32x32xbf16>
    %165 = vector.extract_strided_slice %162 {offsets = [0, 0], sizes = [8, 16], strides = [1, 1]} : vector<8x96xbf16> to vector<8x16xbf16>
    %166 = vector.extract_strided_slice %162 {offsets = [0, 32], sizes = [8, 16], strides = [1, 1]} : vector<8x96xbf16> to vector<8x16xbf16>
    %167 = vector.extract_strided_slice %162 {offsets = [0, 64], sizes = [8, 16], strides = [1, 1]} : vector<8x96xbf16> to vector<8x16xbf16>
    %cst_77 = arith.constant dense<0.000000e+00> : vector<8x8xf32>
    %168 = tpu.matmul %165, %166, %cst_77 {dimension_numbers = #tpu.dot_dimension_numbers<[1], [1], [0], [0], [0, 0, 1, 0], [], []>} : vector<8x16xbf16>, vector<8x16xbf16>, vector<8x8xf32> -> vector<8x8xf32>
    %169 = arith.addf %168, %7 : vector<8x8xf32>
    %cst_78 = arith.constant dense<0xFF800000> : vector<8xf32>
    %170 = vector.multi_reduction <maximumf>, %169, %cst_78 [1] : vector<8x8xf32> to vector<8xf32>
    %171 = vector.shape_cast %170 : vector<8xf32> to vector<8x1xf32>
    %172 = vector.broadcast %171 : vector<8x1xf32> to vector<8x8xf32>
    %173 = arith.subf %169, %172 : vector<8x8xf32>
    %174 = math.exp %173 : vector<8x8xf32>
    %cst_79 = arith.constant dense<0.000000e+00> : vector<8xf32>
    %175 = vector.multi_reduction <add>, %174, %cst_79 [1] : vector<8x8xf32> to vector<8xf32>
    %176 = vector.shape_cast %175 : vector<8xf32> to vector<8x1xf32>
    %177 = tpu.reciprocal %176 {approx = true} : vector<8x1xf32> -> vector<8x1xf32>
    %178 = vector.broadcast %177 : vector<8x1xf32> to vector<8x8xf32>
    %179 = arith.mulf %174, %178 : vector<8x8xf32>
    %180 = arith.truncf %179 : vector<8x8xf32> to vector<8x8xbf16>
    %cst_80 = arith.constant dense<0.000000e+00> : vector<8x16xf32>
    %181 = tpu.matmul %180, %167, %cst_80 {dimension_numbers = #tpu.dot_dimension_numbers<[1], [0], [0], [1], [0, 0, 1, 1], [], []>} : vector<8x8xbf16>, vector<8x16xbf16>, vector<8x16xf32> -> vector<8x16xf32>
    %182 = arith.truncf %181 : vector<8x16xf32> to vector<8x16xbf16>
    %183 = vector.extract_strided_slice %164 {offsets = [0, 0], sizes = [16, 32], strides = [1, 1]} : vector<32x32xbf16> to vector<16x32xbf16>
    %cst_81 = arith.constant dense<0.000000e+00> : vector<8x32xf32>
    %184 = tpu.matmul %182, %183, %cst_81 {dimension_numbers = #tpu.dot_dimension_numbers<[1], [0], [0], [1], [0, 0, 1, 1], [], []>} : vector<8x16xbf16>, vector<16x32xbf16>, vector<8x32xf32> -> vector<8x32xf32>
    %185 = vector.extract_strided_slice %162 {offsets = [0, 16], sizes = [8, 16], strides = [1, 1]} : vector<8x96xbf16> to vector<8x16xbf16>
    %186 = vector.extract_strided_slice %162 {offsets = [0, 48], sizes = [8, 16], strides = [1, 1]} : vector<8x96xbf16> to vector<8x16xbf16>
    %187 = vector.extract_strided_slice %162 {offsets = [0, 80], sizes = [8, 16], strides = [1, 1]} : vector<8x96xbf16> to vector<8x16xbf16>
    %cst_82 = arith.constant dense<0.000000e+00> : vector<8x8xf32>
    %188 = tpu.matmul %185, %186, %cst_82 {dimension_numbers = #tpu.dot_dimension_numbers<[1], [1], [0], [0], [0, 0, 1, 0], [], []>} : vector<8x16xbf16>, vector<8x16xbf16>, vector<8x8xf32> -> vector<8x8xf32>
    %189 = arith.addf %188, %7 : vector<8x8xf32>
    %cst_83 = arith.constant dense<0xFF800000> : vector<8xf32>
    %190 = vector.multi_reduction <maximumf>, %189, %cst_83 [1] : vector<8x8xf32> to vector<8xf32>
    %191 = vector.shape_cast %190 : vector<8xf32> to vector<8x1xf32>
    %192 = vector.broadcast %191 : vector<8x1xf32> to vector<8x8xf32>
    %193 = arith.subf %189, %192 : vector<8x8xf32>
    %194 = math.exp %193 : vector<8x8xf32>
    %cst_84 = arith.constant dense<0.000000e+00> : vector<8xf32>
    %195 = vector.multi_reduction <add>, %194, %cst_84 [1] : vector<8x8xf32> to vector<8xf32>
    %196 = vector.shape_cast %195 : vector<8xf32> to vector<8x1xf32>
    %197 = tpu.reciprocal %196 {approx = true} : vector<8x1xf32> -> vector<8x1xf32>
    %198 = vector.broadcast %197 : vector<8x1xf32> to vector<8x8xf32>
    %199 = arith.mulf %194, %198 : vector<8x8xf32>
    %200 = arith.truncf %199 : vector<8x8xf32> to vector<8x8xbf16>
    %cst_85 = arith.constant dense<0.000000e+00> : vector<8x16xf32>
    %201 = tpu.matmul %200, %187, %cst_85 {dimension_numbers = #tpu.dot_dimension_numbers<[1], [0], [0], [1], [0, 0, 1, 1], [], []>} : vector<8x8xbf16>, vector<8x16xbf16>, vector<8x16xf32> -> vector<8x16xf32>
    %202 = arith.truncf %201 : vector<8x16xf32> to vector<8x16xbf16>
    %203 = vector.extract_strided_slice %164 {offsets = [16, 0], sizes = [16, 32], strides = [1, 1]} : vector<32x32xbf16> to vector<16x32xbf16>
    %cst_86 = arith.constant dense<0.000000e+00> : vector<8x32xf32>
    %204 = tpu.matmul %202, %203, %cst_86 {dimension_numbers = #tpu.dot_dimension_numbers<[1], [0], [0], [1], [0, 0, 1, 1], [], []>} : vector<8x16xbf16>, vector<16x32xbf16>, vector<8x32xf32> -> vector<8x32xf32>
    %205 = arith.addf %184, %204 : vector<8x32xf32>
    %206 = arith.addf %131, %205 : vector<8x32xf32>
    %c1_87 = arith.constant 1 : index
    %c0_88 = arith.constant 0 : index
    %c0_89 = arith.constant 0 : index
    %207 = vector.load %arg6[%c1_87, %c0_88, %c0_89] : memref<2x1x32xf32, #tpu.memory_space<vmem>>, vector<1x1x32xf32>
    %208 = vector.shape_cast %207 : vector<1x1x32xf32> to vector<1x32xf32>
    %209 = vector.broadcast %208 : vector<1x32xf32> to vector<8x32xf32>
    %210 = arith.addf %206, %209 : vector<8x32xf32>
    %c1_90 = arith.constant 1 : index
    %c0_91 = arith.constant 0 : index
    %c0_92 = arith.constant 0 : index
    %211 = vector.load %arg7[%c1_90, %c0_91, %c0_92] : memref<2x1x32xf32, #tpu.memory_space<vmem>>, vector<1x1x32xf32>
    %212 = vector.shape_cast %211 : vector<1x1x32xf32> to vector<1x32xf32>
    %c1_93 = arith.constant 1 : index
    %c0_94 = arith.constant 0 : index
    %c0_95 = arith.constant 0 : index
    %213 = vector.load %arg8[%c1_93, %c0_94, %c0_95] : memref<2x1x32xf32, #tpu.memory_space<vmem>>, vector<1x1x32xf32>
    %214 = vector.shape_cast %213 : vector<1x1x32xf32> to vector<1x32xf32>
    %cst_96 = arith.constant dense<0.000000e+00> : vector<8xf32>
    %215 = vector.multi_reduction <add>, %210, %cst_96 [1] : vector<8x32xf32> to vector<8xf32>
    %216 = vector.shape_cast %215 : vector<8xf32> to vector<8x1xf32>
    %cst_97 = arith.constant 3.200000e+01 : f32
    %217 = vector.broadcast %cst_97 : f32 to vector<8x1xf32>
    %218 = arith.divf %216, %217 : vector<8x1xf32>
    %219 = vector.broadcast %218 : vector<8x1xf32> to vector<8x32xf32>
    %220 = arith.subf %210, %219 : vector<8x32xf32>
    %221 = arith.mulf %220, %220 : vector<8x32xf32>
    %cst_98 = arith.constant dense<0.000000e+00> : vector<8xf32>
    %222 = vector.multi_reduction <add>, %221, %cst_98 [1] : vector<8x32xf32> to vector<8xf32>
    %223 = vector.shape_cast %222 : vector<8xf32> to vector<8x1xf32>
    %cst_99 = arith.constant 3.200000e+01 : f32
    %224 = vector.broadcast %cst_99 : f32 to vector<8x1xf32>
    %225 = arith.divf %223, %224 : vector<8x1xf32>
    %226 = vector.broadcast %218 : vector<8x1xf32> to vector<8x32xf32>
    %227 = arith.subf %210, %226 : vector<8x32xf32>
    %cst_100 = arith.constant 9.99999974E-6 : f32
    %228 = vector.broadcast %cst_100 : f32 to vector<8x1xf32>
    %229 = arith.addf %225, %228 : vector<8x1xf32>
    %230 = math.rsqrt %229 : vector<8x1xf32>
    %231 = vector.broadcast %230 : vector<8x1xf32> to vector<8x32xf32>
    %232 = arith.mulf %227, %231 : vector<8x32xf32>
    %233 = vector.broadcast %212 : vector<1x32xf32> to vector<8x32xf32>
    %234 = arith.mulf %232, %233 : vector<8x32xf32>
    %235 = vector.broadcast %214 : vector<1x32xf32> to vector<8x32xf32>
    %236 = arith.addf %234, %235 : vector<8x32xf32>
    %237 = arith.truncf %236 : vector<8x32xf32> to vector<8x32xbf16>
    %c1_101 = arith.constant 1 : index
    %c0_102 = arith.constant 0 : index
    %c0_103 = arith.constant 0 : index
    %238 = vector.load %arg9[%c1_101, %c0_102, %c0_103] : memref<2x32x128xbf16, #tpu.memory_space<vmem>>, vector<1x32x128xbf16>
    %239 = vector.shape_cast %238 : vector<1x32x128xbf16> to vector<32x128xbf16>
    %cst_104 = arith.constant dense<0.000000e+00> : vector<8x128xf32>
    %240 = tpu.matmul %237, %239, %cst_104 {dimension_numbers = #tpu.dot_dimension_numbers<[1], [0], [0], [1], [0, 0, 1, 1], [], []>} : vector<8x32xbf16>, vector<32x128xbf16>, vector<8x128xf32> -> vector<8x128xf32>
    %c1_105 = arith.constant 1 : index
    %c0_106 = arith.constant 0 : index
    %c0_107 = arith.constant 0 : index
    %241 = vector.load %arg10[%c1_105, %c0_106, %c0_107] : memref<2x1x128xf32, #tpu.memory_space<vmem>>, vector<1x1x128xf32>
    %242 = vector.shape_cast %241 : vector<1x1x128xf32> to vector<1x128xf32>
    %243 = vector.broadcast %242 : vector<1x128xf32> to vector<8x128xf32>
    %244 = arith.addf %240, %243 : vector<8x128xf32>
    %cst_108 = arith.constant 0.000000e+00 : f32
    %245 = vector.broadcast %cst_108 : f32 to vector<8x128xf32>
    %246 = arith.maximumf %244, %245 : vector<8x128xf32>
    %247 = arith.truncf %246 : vector<8x128xf32> to vector<8x128xbf16>
    %c1_109 = arith.constant 1 : index
    %c0_110 = arith.constant 0 : index
    %c0_111 = arith.constant 0 : index
    %248 = vector.load %arg11[%c1_109, %c0_110, %c0_111] : memref<2x128x32xbf16, #tpu.memory_space<vmem>>, vector<1x128x32xbf16>
    %249 = vector.shape_cast %248 : vector<1x128x32xbf16> to vector<128x32xbf16>
    %cst_112 = arith.constant dense<0.000000e+00> : vector<8x32xf32>
    %250 = tpu.matmul %247, %249, %cst_112 {dimension_numbers = #tpu.dot_dimension_numbers<[1], [0], [0], [1], [0, 0, 1, 1], [], []>} : vector<8x128xbf16>, vector<128x32xbf16>, vector<8x32xf32> -> vector<8x32xf32>
    %c1_113 = arith.constant 1 : index
    %c0_114 = arith.constant 0 : index
    %c0_115 = arith.constant 0 : index
    %251 = vector.load %arg12[%c1_113, %c0_114, %c0_115] : memref<2x1x32xf32, #tpu.memory_space<vmem>>, vector<1x1x32xf32>
    %252 = vector.shape_cast %251 : vector<1x1x32xf32> to vector<1x32xf32>
    %253 = vector.broadcast %252 : vector<1x32xf32> to vector<8x32xf32>
    %254 = arith.addf %250, %253 : vector<8x32xf32>
    %255 = arith.addf %210, %254 : vector<8x32xf32>
    %256 = arith.truncf %255 : vector<8x32xf32> to vector<8x32xbf16>
    %c0_116 = arith.constant 0 : index
    %c0_117 = arith.constant 0 : index
    %257 = vector.load %arg13[%c0_116, %c0_117] : memref<32x128xbf16, #tpu.memory_space<vmem>>, vector<32x128xbf16>
    %cst_118 = arith.constant dense<0.000000e+00> : vector<8x128xf32>
    %258 = tpu.matmul %256, %257, %cst_118 {dimension_numbers = #tpu.dot_dimension_numbers<[1], [0], [0], [1], [0, 0, 1, 1], [], []>} : vector<8x32xbf16>, vector<32x128xbf16>, vector<8x128xf32> -> vector<8x128xf32>
    %c0_119 = arith.constant 0 : index
    %c0_120 = arith.constant 0 : index
    %259 = vector.load %arg14[%c0_119, %c0_120] : memref<1x128xf32, #tpu.memory_space<vmem>>, vector<1x128xf32>
    %260 = vector.broadcast %259 : vector<1x128xf32> to vector<8x128xf32>
    %261 = arith.addf %258, %260 : vector<8x128xf32>
    %c0_121 = arith.constant 0 : index
    %c0_122 = arith.constant 0 : index
    %c0_123 = arith.constant 0 : index
    %262 = vector.load %arg15[%c0_121, %c0_122, %c0_123] : memref<1x8x128xf32, #tpu.memory_space<vmem>>, vector<1x8x128xf32>
    %263 = vector.shape_cast %262 : vector<1x8x128xf32> to vector<8x128xf32>
    %264 = vector.shape_cast %261 : vector<8x128xf32> to vector<1x8x128xf32>
    tpu.vector_store %arg15[%c0_121, %c0_122, %c0_123], %264 {strides = array<i32>} : memref<1x8x128xf32, #tpu.memory_space<vmem>>, vector<1x8x128xf32>,
    return
  }
  func.func @transform_0(%arg0: i32) -> (i32, i32, i32) {
    %c0_i32 = arith.constant 0 : i32
    %c0_i32_0 = arith.constant 0 : i32
    %c0_i32_1 = arith.constant 0 : i32
    return %arg0, %c0_i32, %c0_i32_0 : i32, i32, i32
  }
  func.func @transform_1(%arg0: i32) -> (i32, i32, i32) {
    %c0_i32 = arith.constant 0 : i32
    %c0_i32_0 = arith.constant 0 : i32
    %c0_i32_1 = arith.constant 0 : i32
    %c0_i32_2 = arith.constant 0 : i32
    return %c0_i32, %c0_i32_0, %c0_i32_1 : i32, i32, i32
  }
  func.func @transform_2(%arg0: i32) -> (i32, i32, i32) {
    %c0_i32 = arith.constant 0 : i32
    %c0_i32_0 = arith.constant 0 : i32
    %c0_i32_1 = arith.constant 0 : i32
    %c0_i32_2 = arith.constant 0 : i32
    return %c0_i32, %c0_i32_0, %c0_i32_1 : i32, i32, i32
  }
  func.func @transform_3(%arg0: i32) -> (i32, i32, i32) {
    %c0_i32 = arith.constant 0 : i32
    %c0_i32_0 = arith.constant 0 : i32
    %c0_i32_1 = arith.constant 0 : i32
    %c0_i32_2 = arith.constant 0 : i32
    return %c0_i32, %c0_i32_0, %c0_i32_1 : i32, i32, i32
  }
  func.func @transform_4(%arg0: i32) -> (i32, i32, i32) {
    %c0_i32 = arith.constant 0 : i32
    %c0_i32_0 = arith.constant 0 : i32
    %c0_i32_1 = arith.constant 0 : i32
    %c0_i32_2 = arith.constant 0 : i32
    return %c0_i32, %c0_i32_0, %c0_i32_1 : i32, i32, i32
  }
  func.func @transform_5(%arg0: i32) -> (i32, i32, i32) {
    %c0_i32 = arith.constant 0 : i32
    %c0_i32_0 = arith.constant 0 : i32
    %c0_i32_1 = arith.constant 0 : i32
    %c0_i32_2 = arith.constant 0 : i32
    return %c0_i32, %c0_i32_0, %c0_i32_1 : i32, i32, i32
  }
  func.func @transform_6(%arg0: i32) -> (i32, i32, i32) {
    %c0_i32 = arith.constant 0 : i32
    %c0_i32_0 = arith.constant 0 : i32
    %c0_i32_1 = arith.constant 0 : i32
    %c0_i32_2 = arith.constant 0 : i32
    return %c0_i32, %c0_i32_0, %c0_i32_1 : i32, i32, i32
  }
  func.func @transform_7(%arg0: i32) -> (i32, i32, i32) {
    %c0_i32 = arith.constant 0 : i32
    %c0_i32_0 = arith.constant 0 : i32
    %c0_i32_1 = arith.constant 0 : i32
    %c0_i32_2 = arith.constant 0 : i32
    return %c0_i32, %c0_i32_0, %c0_i32_1 : i32, i32, i32
  }
  func.func @transform_8(%arg0: i32) -> (i32, i32, i32) {
    %c0_i32 = arith.constant 0 : i32
    %c0_i32_0 = arith.constant 0 : i32
    %c0_i32_1 = arith.constant 0 : i32
    %c0_i32_2 = arith.constant 0 : i32
    return %c0_i32, %c0_i32_0, %c0_i32_1 : i32, i32, i32
  }
  func.func @transform_9(%arg0: i32) -> (i32, i32, i32) {
    %c0_i32 = arith.constant 0 : i32
    %c0_i32_0 = arith.constant 0 : i32
    %c0_i32_1 = arith.constant 0 : i32
    %c0_i32_2 = arith.constant 0 : i32
    return %c0_i32, %c0_i32_0, %c0_i32_1 : i32, i32, i32
  }
  func.func @transform_10(%arg0: i32) -> (i32, i32, i32) {
    %c0_i32 = arith.constant 0 : i32
    %c0_i32_0 = arith.constant 0 : i32
    %c0_i32_1 = arith.constant 0 : i32
    %c0_i32_2 = arith.constant 0 : i32
    return %c0_i32, %c0_i32_0, %c0_i32_1 : i32, i32, i32
  }
  func.func @transform_11(%arg0: i32) -> (i32, i32, i32) {
    %c0_i32 = arith.constant 0 : i32
    %c0_i32_0 = arith.constant 0 : i32
    %c0_i32_1 = arith.constant 0 : i32
    %c0_i32_2 = arith.constant 0 : i32
    return %c0_i32, %c0_i32_0, %c0_i32_1 : i32, i32, i32
  }
  func.func @transform_12(%arg0: i32) -> (i32, i32) {
    %c0_i32 = arith.constant 0 : i32
    %c0_i32_0 = arith.constant 0 : i32
    %c0_i32_1 = arith.constant 0 : i32
    return %c0_i32, %c0_i32_0 : i32, i32
  }
  func.func @transform_13(%arg0: i32) -> (i32, i32) {
    %c0_i32 = arith.constant 0 : i32
    %c0_i32_0 = arith.constant 0 : i32
    %c0_i32_1 = arith.constant 0 : i32
    return %c0_i32, %c0_i32_0 : i32, i32
  }
  func.func @transform_14(%arg0: i32) -> (i32, i32, i32) {
    %c0_i32 = arith.constant 0 : i32
    %c0_i32_0 = arith.constant 0 : i32
    %c0_i32_1 = arith.constant 0 : i32
    return %arg0, %c0_i32, %c0_i32_0 : i32, i32, i32
  }
}

</mosaic_0001>

<bundles_post_ra>
// kernel: bigram_lm_forward.1
= control target key start
LH: loop header
LB: loop body
LE: loop exit
PB: predicated region body
PF: predicated region fallthrough
CT: control target
= control target key end

     0   :  { %s2842_s0 = inlined_call_operand.vmem [shape: f32[2,8,32], index: 0, kind: input, shape index: {}]   ;;  %s2843_s1 = inlined_call_operand.vmem [shape: f32[2,1,32], index: 1, kind: input, shape index: {}]   ;;  %s2844_s2 = inlined_call_operand.vmem [shape: f32[2,1,32], index: 2, kind: input, shape index: {}]   ;;  %s2845_s3 = inlined_call_operand.vmem [shape: bf16[2,32,96], index: 3, kind: input, shape index: {}]   ;;  %s2846_s4 = inlined_call_operand.vmem [shape: bf16[2,32,32], index: 4, kind: input, shape index: {}]   ;;  %s2847_s5 = inlined_call_operand.vmem [shape: f32[2,1,32], index: 5, kind: input, shape index: {}]   ;;  %s2848_s6 = inlined_call_operand.vmem [shape: f32[2,1,32], index: 6, kind: input, shape index: {}]   ;;  %s2849_s7 = inlined_call_operand.vmem [shape: f32[2,1,32], index: 7, kind: input, shape index: {}]   ;;  %s2850_s8 = inlined_call_operand.vmem [shape: bf16[2,32,128], index: 8, kind: input, shape index: {}]   ;;  %s2851_s9 = inlined_call_operand.vmem [shape: f32[2,1,128], index: 9, kind: input, shape index: {}]   ;;  %s2852_s10 = inlined_call_operand.vmem [shape: bf16[2,128,32], index: 10, kind: input, shape index: {}]   ;;  %s2853_s11 = inlined_call_operand.vmem [shape: f32[2,1,32], index: 11, kind: input, shape index: {}]   ;;  %s2854_s12 = inlined_call_operand.vmem [shape: bf16[32,128], index: 12, kind: input, shape index: {}]   ;;  %s2855_s13 = inlined_call_operand.vmem [shape: f32[1,128], index: 13, kind: input, shape index: {}]   ;;  %s2856_s14 = inlined_call_operand.hbm [shape: f32[2,8,128], index: 14, kind: output, shape index: {}]  }
   0x1   :  { %2862 = sst [smem:[#allocation5_spill]] %s2842_s0 }
   0x2   :  { %2863 = sst [smem:[#allocation6_spill]] %s2843_s1 }
   0x3   :  { %2864 = sst [smem:[#allocation7_spill]] %s2844_s2 }
   0x4   :  { %2865 = sst [smem:[#allocation8_spill]] %s2845_s3 }
   0x5   :  { %19 = vsyncpa [#allocation3], 0 }
   0x6   :  { %21 = vsyncpa [#allocation3 + $0x1], 0  ;;  %s2455_s29 = smov 0   ;;  %s2457_s30 = smov 0  }
   0x7   :  { %s2459_s15 = smov 0   ;;  %s2461_s16 = smov 0  }
   0x8 LB: > { %s2476_s17 = sadd.s32 4294967295, %s2369_s16   ;;  %s1892_s18 = sadd.s32 4294967294, %s2369_s16   ;;  %s2369_s16 = sphi %s2461_s16, %s2880_s16   ;;  %s2365_s15 = sphi %s2459_s15, %s2879_s15   ;;  %s2361_s30 = sphi %s2457_s30, %s2878_s30   ;;  %s2357_s29 = sphi %s2455_s29, %s2877_s29  }
   0x9   : > { %s2480_s19 = sadd.s32 1, %s2369_s16   ;;  %s333_s20 = sadd.s32 1, %s2365_s15 }
   0xa   : > { %s330_s21 = ssub.s32 %s2369_s16, %s2480_s19  ;;  %p343_p0 = scmp.ne.s32.totalorder %s2365_s15, %s2361_s30 }
   0xb   : > { %p331_p1 = scmp.eq.s32.totalorder %s330_s21, 0  ;;  %p344_p2 = scmp.eq.s32.totalorder %s2476_s17, 1 }
   0xc   : > { %p349_p3 = scmp.ne.s32.totalorder %s2361_s30, %s2357_s29  ;;  %p350_p4 = scmp.eq.s32.totalorder %s1892_s18, 1 }
   0xd   : > { %s2491_s22 = scalar_select %p331_p1, %s2365_s15, %s333_s20  }
   0xe   : > { %p2493_p5 = por %p344_p2, %p343_p0  ;;  %p2497_p6 = por %p350_p4, %p349_p3 }
   0xf   : > { %p1895_p7 = scmp.ge.s32.totalorder %s2369_s16, 1  ;;  %p414_p8 = scmp.lt.s32.totalorder %s2369_s16, 3 }
  0x11   : > { %p415_p9 = pnand %p1895_p7, %p414_p8 }
  0x12   : > { %p459_p10 = scmp.lt.s32.totalorder (!%p415_p9), %s2476_s17, 1  ;;  %s2868_s0 = sld [smem:[#allocation5_spill]] (!%p415_p9) }
  0x13   : > { %418 = sbr.rel (%p415_p9) target bundleno = 5239 (0x1477), region = 76  ;;  %s2869_s3 = sld [smem:[#allocation8_spill]] (!%p415_p9) }
  0x14   : > { %s2870_s1 = sld [smem:[#allocation6_spill]] (!%p415_p9)  ;;  %s2859_s21 = smov (!%p415_p9), 112  }
  0x15   : > { %s2871_s2 = sld [smem:[#allocation7_spill]] (!%p415_p9)  ;;  %s2857_s27 = smov (!%p415_p9), 48  }
  0x16   : > { %s2858_s28 = smov (!%p415_p9), 64  }
  0x18   : > { %s460_s25 = scalar_select %p459_p10, %s2476_s17, 1  ;;  %vm473_vm0 = vcmask 261120   ;;  %v2371_v8 = vmov 0.0   ;;  %vm2372_vm1 = vmmov 0   ;;  %vm570_vm2 = vcmask 130048  }
  0x19   : > { %v2255_v7 = vld [vmem:[%s2869_s3 + $0x8] sm:$0xff]   ;;  %2056 = vmatprep.subr.bf16.mxu1 %v2371_v8  ;;  %2060 = vmatprep.mubr.msk.bf16.mxu1 %vm2372_vm1, %v2371_v8  ;;  %v2256_v9 = vld [vmem:[%s2869_s3] sm:$0xff]   ;;  %v465_v30 = vlaneseq  ;;  %v2376_v33 = vmov -1e+30   ;;  %vm617_vm4 = vcmask 64512   ;;  %vm635_vm5 = vcmask 1043456  }
  0x1a   : > { %s1897_s26 = sshll.u32 %s460_s25, 3  ;;  %2057 = vmatpush3.bf16.msra.mxu1 %v2255_v7  ;;  %2070 = vmatprep.subr.bf16.mxu0 %v2371_v8  ;;  %v1898_v14 = vld [vmem:[%s2870_s1] ss:$0 sm:$0xff]  ;;  %s2861_s25 = smov 96   ;;  %v2258_v7 = vld [vmem:[%s2846_s4 + $0x8] sm:$0xff]  }
  0x1b   : > { %s462_s18 = scalar_lea.vmem %s2868_s0, %s1897_s26  ;;  %2058 = vmatprep.subr.bf16.mxu1 %v2371_v8  ;;  %2072 = vmatprep.mubr.msk.bf16.mxu0 %vm2372_vm1, %v2371_v8  ;;  %v1899_v16 = vld [vmem:[%s2871_s2] ss:$0 sm:$0xff]  ;;  %s2860_s26 = smov 80   ;;  %v466_v31 = vshrl.u32 %v465_v30, 7  ;;  %v468_v32 = vand.u32 127, %v465_v30 }
  0x1c   : > { %v2508_v0 = vld [vmem:[%s462_s18] sm:$0xff]  ;;  %s2873_s0 = smov 80   ;;  %s2876_s18 = smov 48  }
  0x1d   : > { %v474_v1 = vsel %vm473_vm0, %v2508_v0, 0.0  ;;  %vm469_vm3 = vcmp.le.s32.totalorder %v468_v32, %v466_v31 }
  0x1e   : > { %475 = vadd.xlane.f32.xlu0 %v474_v1  ;;  %2059 = vmatpush3.bf16.msra.mxu1 %v2256_v9  ;;  %v2550_v34 = vsel %vm469_vm3, 0.0, %v2376_v33 }
  0x1f   : > { %2064 = vmatprep.subr.bf16.mxu1 %v2371_v8 }
  0xa7   : > { %v476_v2 = vpop.xlane.xlu0 %475 }
  0xa8   : > { %v478_v3 = vmul.f32 0.03125, %v476_v2 }
  0xaa   : > { %v479_v4 = vsub.f32 %v2508_v0, %v478_v3 }
  0xac   : > { %v480_v5 = vmul.f32 %v479_v4, %v479_v4 }
  0xae   : > { %v481_v6 = vsel %vm473_vm0, %v480_v5, 0.0 }
  0xaf   : > { %482 = vadd.xlane.f32.xlu0 %v481_v6  ;;  %v2257_v6 = vld [vmem:[%s2846_s4] sm:$0xff]  }
 0x138   : > { %v483_v10 = vpop.xlane.xlu0 %482 }
 0x139   : > { %v484_v11 = vmul.f32 0.03125, %v483_v10 }
 0x13b   : > { %v485_v12 = vadd.f32 1e-05, %v484_v11 }
 0x13d   : > { %2285 = vrsqrt.f32 %v485_v12 }
 0x14a   : > { %v2286_v13 = vpop.eup %2285 }
 0x14b   : > { %v487_v15 = vmul.f32 %v2286_v13, %v479_v4 }
 0x14d   : > { %v494_v17 = vmul.f32 %v1898_v14, %v487_v15 }
 0x14f   : > { %v501_v18 = vadd.f32 %v1899_v16, %v494_v17 }
 0x151   : > { %v502_v19 = vpack.c.bf16 %v501_v18, %v501_v18 }
 0x153   : > { %2061 = vmatmul.mubr.msk.bf16.vlgmr.msra.gmra.mxu1 %vm473_vm0, %v502_v19 }
 0x154   : > { %2066 = vmatprep.mubr.msk.bf16.mxu1 %vm2372_vm1, %v2371_v8 }
 0x213   : > { %v556_v20 = vpop.f32.mrf.mxu1 }
 0x214   : > { %v562_v21 = vpack.c.bf16 %v556_v20, %v556_v20 }
 0x215   : > { %v2062_v22 = vpop.f32.mrf.mxu1 }
 0x216   : > { %680 = vrot.lane.b32.xlu0 %v562_v21, %s2859_s21  ;;  %568 = vrot.lane.b32.xlu1 %v562_v21, %s2861_s25  ;;  %s2872_s21 = smov 96   ;;  %s2874_s25 = smov 112  }
 0x217   : > { %v559_v23 = vpop.f32.mrf.mxu1 }
 0x219   : > { %v2063_v24 = vpop.f32.mrf.mxu1 }
 0x21a   : > { %682 = vrot.lane.b32.xlu1 %v562_v21, %s2860_s26  ;;  %s2875_s26 = smov 64  }
 0x288   : > { %v569_v25 = vpop.permute.xlu1 %568  ;;  %v681_v29 = vpop.permute.xlu0 %680 }
 0x289   : > { %v575_v26 = vsel %vm570_vm2, %v569_v25, 0  ;;  %v1911_v25 = vld [vmem:[%s2847_s5] ss:$0 sm:$0xff] }
 0x28a   : > { %2065 = vmatpush3.bf16.xpose.msra.mxu1 %v575_v26 }
 0x28b   : > { %2076 = vmatprep.subr.bf16.mxu1 %v2371_v8 }
 0x28c   : > { %v683_v27 = vpop.permute.xlu1 %682 }
 0x28d   : > { %v688_v28 = vsel %vm570_vm2, %v683_v27, 0 }
 0x291   : > { %2067 = vmatmul.mubr.msk.bf16.vlgmr.msra.gmra.mxu1 %vm570_vm2, %v562_v21 }
 0x292   : > { %2077 = vmatpush3.bf16.xpose.msra.mxu1 %v688_v28  ;;  %2078 = vmatprep.mubr.msk.bf16.mxu1 %vm2372_vm1, %v2371_v8 }
 0x293   : > { %2088 = vmatprep.subr.bf16.mxu1 %v2371_v8 }
 0x299   : > { %2079 = vmatmul.mubr.msk.bf16.vlgmr.msra.gmra.mxu1 %vm570_vm2, %v681_v29 }
 0x29a   : > { %2090 = vmatprep.mubr.msk.bf16.mxu1 %vm2372_vm1, %v2371_v8  ;;  %2089 = vmatpush3.bf16.msra.mxu1 %v2258_v7 }
 0x29b   : > { %2100 = vmatprep.subr.bf16.mxu1 %v2371_v8 }
 0x351   : > { %v611_v35 = vpop.f32.mrf.mxu1 }
 0x352   : > { %v612_v36 = vadd.f32 %v611_v35, %v2550_v34 }
 0x353   : > { %v2068_v37 = vpop.f32.mrf.mxu1 }
 0x354   : > { %v618_v38 = vsel %vm617_vm4, %v612_v36, -inf }
 0x355   : > { %619 = vmax.xlane.f32.xlu1 %v618_v38  ;;  %v614_v39 = vpop.f32.mrf.mxu1  ;;  %v2260_v38 = vld [vmem:[%s2850_s8] sm:$0xff]  }
 0x356   : > { %v2261_v39 = vld [vmem:[%s2852_s10 + $0x38] sm:$0xff]  }
 0x357   : > { %v2069_v40 = vpop.f32.mrf.mxu1 }
 0x358   : > { %v2262_v40 = vld [vmem:[%s2852_s10 + $0x30] sm:$0xff]  }
 0x359   : > { %v724_v41 = vpop.f32.mrf.mxu1 }
 0x35a   : > { %v725_v42 = vadd.f32 %v724_v41, %v2550_v34  ;;  %v2263_v41 = vld [vmem:[%s2852_s10 + $0x28] sm:$0xff]  }
 0x35b   : > { %v2080_v43 = vpop.f32.mrf.mxu1 }
 0x35c   : > { %v730_v44 = vsel %vm617_vm4, %v725_v42, -inf  ;;  %v2265_v43 = vld [vmem:[%s2852_s10 + $0x18] sm:$0xff]  }
 0x35d   : > { %731 = vmax.xlane.f32.xlu0 %v730_v44  ;;  %v727_v45 = vpop.f32.mrf.mxu1  ;;  %v2266_v44 = vld [vmem:[%s2852_s10 + $0x10] sm:$0xff]  }
 0x35f   : > { %v2081_v46 = vpop.f32.mrf.mxu1 }
 0x373   : > { %742 = vrot.lane.b32.xlu0 %v562_v21, %s2857_s27 }
 0x3de   : > { %v620_v47 = vpop.xlane.xlu1 %619 }
 0x3df   : > { %v621_v48 = vsub.f32 %v612_v36, %v620_v47 }
 0x3e1   : > { %v622_v49 = vmul.f32 1.442695, %v621_v48 }
 0x3e3   : > { %2287 = vpow2.f32 %v622_v49  ;;  %v1912_v49 = vld [vmem:[%s2848_s6] ss:$0 sm:$0xff] }
 0x3e6   : > { %v732_v50 = vpop.xlane.xlu0 %731 }
 0x3e7   : > { %v733_v51 = vsub.f32 %v725_v42, %v732_v50  ;;  %v2264_v42 = vld [vmem:[%s2852_s10 + $0x20] sm:$0xff]  }
 0x3e9   : > { %v734_v52 = vmul.f32 1.442695, %v733_v51  ;;  %v1913_v51 = vld [vmem:[%s2849_s7] ss:$0 sm:$0xff] }
 0x3ea   : > { %v743_v63 = vpop.permute.xlu0 %742 }
 0x3eb   : > { %2289 = vpow2.f32 %v734_v52  ;;  %v748_v2 = vsel %vm635_vm5, %v743_v63, 0 }
 0x3f0   : > { %v2288_v53 = vpop.eup %2287 }
 0x3f1   : > { %v624_v54 = vsel %vm617_vm4, %v2288_v53, 0.0 }
 0x3f2   : > { %625 = vadd.xlane.f32.xlu1 %v624_v54 }
 0x3f8   : > { %v2290_v55 = vpop.eup %2289 }
 0x3f9   : > { %v736_v56 = vsel %vm617_vm4, %v2290_v55, 0.0 }
 0x3fa   : > { %737 = vadd.xlane.f32.xlu1 %v736_v56  ;;  %v2268_v56 = vld [vmem:[%s2852_s10] sm:$0xff]  }
 0x40b   : > { %630 = vrot.lane.b32.xlu1 %v562_v21, %s2858_s28  ;;  %s1996_s28 = sshll.u32 %s2476_s17, 7  ;;  %s2379_s17 = smov [#allocation2]  }
 0x47b   : > { %v626_v57 = vpop.xlane.xlu1 %625 }
 0x47c   : > { %2291 = vrcp.f32 %v626_v57  ;;  %v1914_v57 = vld [vmem:[%s2851_s9] ss:$0 sm:$0xff] }
 0x483   : > { %v738_v58 = vpop.xlane.xlu1 %737 }
 0x484   : > { %2293 = vrcp.f32 %v738_v58 }
 0x487   : > { %v631_v59 = vpop.permute.xlu1 %630 }
 0x488   : > { %v637_v60 = vsel %vm635_vm5, %v631_v59, 0 }
 0x489   : > { %v2292_v61 = vpop.eup %2291  ;;  %2071 = vmatpush3.bf16.msra.mxu0 %v637_v60 }
 0x48a   : > { %2082 = vmatprep.subr.bf16.mxu0 %v2371_v8  ;;  %v628_v62 = vmul.f32 %v2292_v61, %v2288_v53 }
 0x48c   : > { %v629_v1 = vpack.c.bf16 %v628_v62, %v628_v62 }
 0x48e   : > { %2073 = vmatmul.mubr.msk.bf16.vlgmr.msra.gmra.mxu0 %vm617_vm4, %v629_v1 }
 0x48f   : > { %2083 = vmatpush3.bf16.msra.mxu0 %v748_v2  ;;  %2084 = vmatprep.mubr.msk.bf16.mxu0 %vm2372_vm1, %v2371_v8  ;;  %v1918_v2 = vld [vmem:[%s2853_s11] ss:$0 sm:$0xff] }
 0x490   : > { %2094 = vmatprep.subr.bf16.mxu0 %v2371_v8 }
 0x491   : > { %v2294_v3 = vpop.eup %2293 }
 0x492   : > { %v740_v4 = vmul.f32 %v2294_v3, %v2290_v55  ;;  %v2267_v55 = vld [vmem:[%s2852_s10 + $0x8] sm:$0xff]  }
 0x494   : > { %v741_v5 = vpack.c.bf16 %v740_v4, %v740_v4 }
 0x496   : > { %2085 = vmatmul.mubr.msk.bf16.vlgmr.msra.gmra.mxu0 %vm617_vm4, %v741_v5 }
 0x497   : > { %2096 = vmatprep.mubr.msk.bf16.mxu0 %vm2372_vm1, %v2371_v8  ;;  %2095 = vmatpush3.bf16.msra.mxu0 %v2257_v6 }
 0x498   : > { %2108 = vmatprep.subr.bf16.mxu0 %v2371_v8 }
 0x54e   : > { %v673_v9 = vpop.f32.mrf.mxu0 }
 0x54f   : > { %v679_v10 = vpack.c.bf16 %v673_v9, %v673_v9 }
 0x550   : > { %v2074_v11 = vpop.f32.mrf.mxu0 }
 0x551   : > { %2097 = vmatmul.mubr.msk.bf16.vlgmr.msra.gmra.mxu0 %vm570_vm2, %v679_v10 }
 0x552   : > { %v676_v12 = vpop.f32.mrf.mxu0  ;;  %2124 = vmatprep.mubr.msk.bf16.mxu0 %vm2372_vm1, %v2371_v8  ;;  %2109 = vmatpush3.bf16.msra.mxu0 %v2261_v39 }
 0x553   : > { %2110 = vmatprep.subr.bf16.mxu0 %v2371_v8 }
 0x554   : > { %v2075_v13 = vpop.f32.mrf.mxu0 }
 0x556   : > { %v784_v14 = vpop.f32.mrf.mxu0  ;;  %2111 = vmatpush3.bf16.msra.mxu0 %v2262_v40 }
 0x557   : > { %v790_v15 = vpack.c.bf16 %v784_v14, %v784_v14  ;;  %2112 = vmatprep.subr.bf16.mxu0 %v2371_v8 }
 0x558   : > { %v2086_v16 = vpop.f32.mrf.mxu0 }
 0x559   : > { %2091 = vmatmul.mubr.msk.bf16.vlgmr.msra.gmra.mxu1 %vm570_vm2, %v790_v15  ;;  %v2269_v16 = vld [vmem:[%s2869_s3 + $0x18] sm:$0xff]  }
 0x55a   : > { %v787_v17 = vpop.f32.mrf.mxu0  ;;  %2104 = vmatprep.mubr.msk.bf16.mxu1 %vm2372_vm1, %v2371_v8  ;;  %2113 = vmatpush3.bf16.msra.mxu0 %v2263_v41 }
 0x55b   : > { %2114 = vmatprep.subr.bf16.mxu0 %v2371_v8  ;;  %v2270_v17 = vld [vmem:[%s2869_s3 + $0x10] sm:$0xff]  }
 0x55c   : > { %v2087_v18 = vpop.f32.mrf.mxu0 }
 0x55e   : > { %2115 = vmatpush3.bf16.msra.mxu0 %v2264_v42 }
 0x55f   : > { %2116 = vmatprep.subr.bf16.mxu0 %v2371_v8 }
 0x562   : > { %2117 = vmatpush3.bf16.msra.mxu0 %v2265_v43 }
 0x563   : > { %2118 = vmatprep.subr.bf16.mxu0 %v2371_v8 }
 0x566   : > { %2119 = vmatpush3.bf16.msra.mxu0 %v2266_v44 }
 0x567   : > { %2120 = vmatprep.subr.bf16.mxu0 %v2371_v8 }
 0x56a   : > { %2121 = vmatpush3.bf16.msra.mxu0 %v2267_v55 }
 0x56b   : > { %2122 = vmatprep.subr.bf16.mxu0 %v2371_v8 }
 0x56e   : > { %2123 = vmatpush3.bf16.msra.mxu0 %v2268_v56 }
 0x56f   : > { %2154 = vmatprep.subr.bf16.mxu0 %v2371_v8 }
 0x611   : > { %v883_v19 = vpop.f32.mrf.mxu0 }
 0x613   : > { %v2098_v20 = vpop.f32.mrf.mxu0 }
 0x615   : > { %v886_v21 = vpop.f32.mrf.mxu0 }
 0x617   : > { %v2099_v22 = vpop.f32.mrf.mxu0 }
 0x618   : > { %v1929_v22 = vld [vmem:[%s2870_s1 + $0x1] ss:$0 sm:$0xff] }
 0x619   : > { %v834_v23 = vpop.f32.mrf.mxu1 }
 0x61a   : > { %v884_v24 = vadd.f32 %v883_v19, %v834_v23 }
 0x61b   : > { %v2092_v26 = vpop.f32.mrf.mxu1 }
 0x61c   : > { %v889_v27 = vadd.f32 %v884_v24, %v2508_v0  ;;  %v2259_v0 = vld [vmem:[%s2850_s8 + $0x8] sm:$0xff]   ;;  %v1930_v24 = vld [vmem:[%s2871_s2 + $0x1] ss:$0 sm:$0xff]  ;;  %s2801_s2 = scalar_lea.hbm %s2856_s14, %s1996_s28 }
 0x61d   : > { %v837_v28 = vpop.f32.mrf.mxu1  ;;  %2101 = vmatpush3.bf16.msra.mxu1 %v2259_v0 }
 0x61e   : > { %v2588_v29 = vadd.f32 %v1911_v25, %v889_v27  ;;  %2102 = vmatprep.subr.bf16.mxu1 %v2371_v8 }
 0x61f   : > { %v2093_v30 = vpop.f32.mrf.mxu1 }
 0x620   : > { %v900_v31 = vsel %vm473_vm0, %v2588_v29, 0.0 }
 0x621   : > { %901 = vadd.xlane.f32.xlu1 %v900_v31  ;;  %2103 = vmatpush3.bf16.msra.mxu1 %v2260_v38 }
 0x622   : > { %2128 = vmatprep.subr.bf16.mxu1 %v2371_v8 }
 0x6aa   : > { %v902_v32 = vpop.xlane.xlu1 %901 }
 0x6ab   : > { %v903_v33 = vmul.f32 0.03125, %v902_v32 }
 0x6ad   : > { %v904_v35 = vsub.f32 %v2588_v29, %v903_v33 }
 0x6af   : > { %v905_v36 = vmul.f32 %v904_v35, %v904_v35 }
 0x6b1   : > { %v906_v37 = vsel %vm473_vm0, %v905_v36, 0.0 }
 0x6b2   : > { %907 = vadd.xlane.f32.xlu0 %v906_v37 }
 0x73b   : > { %v908_v45 = vpop.xlane.xlu0 %907 }
 0x73c   : > { %v909_v46 = vmul.f32 0.03125, %v908_v45 }
 0x73e   : > { %v910_v47 = vadd.f32 1e-05, %v909_v46 }
 0x740   : > { %2295 = vrsqrt.f32 %v910_v47 }
 0x74d   : > { %v2296_v48 = vpop.eup %2295 }
 0x74e   : > { %v912_v50 = vmul.f32 %v2296_v48, %v904_v35 }
 0x750   : > { %v919_v52 = vmul.f32 %v1912_v49, %v912_v50 }
 0x752   : > { %v926_v53 = vadd.f32 %v1913_v51, %v919_v52 }
 0x754   : > { %v927_v54 = vpack.c.bf16 %v926_v53, %v926_v53 }
 0x756   : > { %2105 = vmatmul.mubr.msk.bf16.vlgmr.msra.gmra.mxu1 %vm473_vm0, %v927_v54 }
 0x757   : > { %2132 = vmatprep.mubr.msk.bf16.mxu1 %vm2372_vm1, %v2371_v8  ;;  %2129 = vmatpush3.bf16.msra.mxu1 %v2269_v16 }
 0x758   : > { %2130 = vmatprep.subr.bf16.mxu1 %v2371_v8 }
 0x75b   : > { %2131 = vmatpush3.bf16.msra.mxu1 %v2270_v17 }
 0x75c   : > { %2136 = vmatprep.subr.bf16.mxu1 %v2371_v8 }
 0x816   : > { %v988_v58 = vpop.f32.mrf.mxu1 }
 0x817   : > { %v989_v59 = vadd.f32 %v1914_v57, %v988_v58 }
 0x818   : > { %v2106_v60 = vpop.f32.mrf.mxu1 }
 0x819   : > { %v994_v61 = vmax.f32 %v989_v59, 0.0 }
 0x81a   : > { %v991_v62 = vpop.f32.mrf.mxu1 }
 0x81b   : > { %v995_v63 = vpack.c.bf16 %v994_v61, %v994_v61 }
 0x81c   : > { %v2107_v1 = vpop.f32.mrf.mxu1 }
 0x81d   : > { %2125 = vmatmul.mubr.bf16.vlgmr.msra.gmra.mxu0 %v995_v63 }
 0x81e   : > { %2156 = vmatprep.mubr.msk.bf16.mxu0 %vm2372_vm1, %v2371_v8 }
 0x8dd   : > { %v1101_v3 = vpop.f32.mrf.mxu0 }
 0x8de   : > { %v1102_v4 = vadd.f32 %v1918_v2, %v1101_v3 }
 0x8df   : > { %v2126_v5 = vpop.f32.mrf.mxu0 }
 0x8e0   : > { %v2652_v6 = vadd.f32 %v1102_v4, %v2588_v29 }
 0x8e1   : > { %v1104_v7 = vpop.f32.mrf.mxu0 }
 0x8e2   : > { %v1112_v9 = vsel %vm473_vm0, %v2652_v6, 0.0 }
 0x8e3   : > { %1113 = vadd.xlane.f32.xlu1 %v1112_v9  ;;  %v2127_v10 = vpop.f32.mrf.mxu0 }
 0x8e4   : > { %v2272_v10 = vld [vmem:[%s2846_s4 + $0x18] sm:$0xff]  }
 0x96c   : > { %v1114_v11 = vpop.xlane.xlu1 %1113 }
 0x96d   : > { %v1115_v12 = vmul.f32 0.03125, %v1114_v11 }
 0x96f   : > { %v1116_v13 = vsub.f32 %v2652_v6, %v1115_v12 }
 0x971   : > { %v1117_v14 = vmul.f32 %v1116_v13, %v1116_v13 }
 0x973   : > { %v1118_v15 = vsel %vm473_vm0, %v1117_v14, 0.0  ;;  %v2271_v14 = vld [vmem:[%s2846_s4 + $0x10] sm:$0xff]  }
 0x974   : > { %1119 = vadd.xlane.f32.xlu1 %v1118_v15 }
 0x9fd   : > { %v1120_v18 = vpop.xlane.xlu1 %1119 }
 0x9fe   : > { %v1121_v19 = vmul.f32 0.03125, %v1120_v18 }
 0xa00   : > { %v1122_v20 = vadd.f32 1e-05, %v1121_v19 }
 0xa02   : > { %2297 = vrsqrt.f32 %v1122_v20 }
 0xa0f   : > { %v2298_v21 = vpop.eup %2297 }
 0xa10   : > { %v1124_v23 = vmul.f32 %v2298_v21, %v1116_v13 }
 0xa12   : > { %v1131_v25 = vmul.f32 %v1929_v22, %v1124_v23 }
 0xa14   : > { %v1138_v26 = vadd.f32 %v1930_v24, %v1131_v25 }
 0xa16   : > { %v1139_v27 = vpack.c.bf16 %v1138_v26, %v1138_v26 }
 0xa18   : > { %2133 = vmatmul.mubr.msk.bf16.vlgmr.msra.gmra.mxu1 %vm473_vm0, %v1139_v27 }
 0xa19   : > { %2138 = vmatprep.mubr.msk.bf16.mxu1 %vm2372_vm1, %v2371_v8 }
 0xad8   : > { %v1194_v28 = vpop.f32.mrf.mxu1 }
 0xad9   : > { %v1200_v29 = vpack.c.bf16 %v1194_v28, %v1194_v28  ;;  %v1951_v28 = vld [vmem:[%s2847_s5 + $0x1] ss:$0 sm:$0xff] }
 0xada   : > { %v2134_v30 = vpop.f32.mrf.mxu1 }
 0xadb   : > { %1207 = vrot.lane.b32.xlu1 %v1200_v29, %s2872_s21 }
 0xadc   : > { %v1197_v31 = vpop.f32.mrf.mxu1 }
 0xade   : > { %v2135_v32 = vpop.f32.mrf.mxu1 }
 0xadf   : > { %1318 = vrot.lane.b32.xlu1 %v1200_v29, %s2873_s0 }
 0xae3   : > { %1316 = vrot.lane.b32.xlu1 %v1200_v29, %s2874_s25 }
 0xb4d   : > { %v1208_v33 = vpop.permute.xlu1 %1207 }
 0xb4e   : > { %v1213_v35 = vsel %vm570_vm2, %v1208_v33, 0 }
 0xb4f   : > { %2137 = vmatpush3.bf16.xpose.msra.mxu1 %v1213_v35 }
 0xb50   : > { %2142 = vmatprep.subr.bf16.mxu1 %v2371_v8 }
 0xb51   : > { %v1319_v51 = vpop.permute.xlu1 %1318 }
 0xb52   : > { %v1324_v53 = vsel %vm570_vm2, %v1319_v51, 0  ;;  %v1954_v51 = vld [vmem:[%s2848_s6 + $0x1] ss:$0 sm:$0xff] }
 0xb55   : > { %v1317_v54 = vpop.permute.xlu1 %1316 }
 0xb56   : > { %2139 = vmatmul.mubr.msk.bf16.vlgmr.msra.gmra.mxu1 %vm570_vm2, %v1200_v29 }
 0xb57   : > { %2144 = vmatprep.mubr.msk.bf16.mxu1 %vm2372_vm1, %v2371_v8 }
 0xc16   : > { %v1249_v36 = vpop.f32.mrf.mxu1 }
 0xc17   : > { %v1250_v37 = vadd.f32 %v1249_v36, %v2550_v34 }
 0xc18   : > { %v2140_v0 = vpop.f32.mrf.mxu1 }
 0xc19   : > { %v1255_v38 = vsel %vm617_vm4, %v1250_v37, -inf }
 0xc1a   : > { %1256 = vmax.xlane.f32.xlu0 %v1255_v38  ;;  %v1252_v39 = vpop.f32.mrf.mxu1 }
 0xc1c   : > { %v2141_v40 = vpop.f32.mrf.mxu1 }
 0xc1d   : > { %v2274_v40 = vld [vmem:[%s2850_s8 + $0x10] sm:$0xff]  }
 0xca3   : > { %v1257_v41 = vpop.xlane.xlu0 %1256 }
 0xca4   : > { %v1258_v42 = vsub.f32 %v1250_v37, %v1257_v41  ;;  %v2275_v41 = vld [vmem:[%s2852_s10 + $0x78] sm:$0xff]  }
 0xca6   : > { %v1259_v43 = vmul.f32 1.442695, %v1258_v42  ;;  %v2276_v42 = vld [vmem:[%s2852_s10 + $0x70] sm:$0xff]  }
 0xca8   : > { %2299 = vpow2.f32 %v1259_v43  ;;  %v2277_v43 = vld [vmem:[%s2852_s10 + $0x68] sm:$0xff]  }
 0xcb5   : > { %v2300_v44 = vpop.eup %2299 }
 0xcb6   : > { %v1261_v45 = vsel %vm617_vm4, %v2300_v44, 0.0 }
 0xcb7   : > { %1262 = vadd.xlane.f32.xlu0 %v1261_v45  ;;  %v2279_v45 = vld [vmem:[%s2852_s10 + $0x58] sm:$0xff]  }
 0xccd   : > { %1267 = vrot.lane.b32.xlu0 %v1200_v29, %s2875_s26  ;;  %s456_s26 = sand.u32 1, %s2361_s30  }
 0xcce   : > { %s1820_s20 = scalar_lea.sflag [#allocation3], %s456_s26 }
 0xd40   : > { %v1263_v46 = vpop.xlane.xlu0 %1262 }
 0xd41   : > { %2301 = vrcp.f32 %v1263_v46  ;;  %v2280_v46 = vld [vmem:[%s2852_s10 + $0x50] sm:$0xff]  }
 0xd44   : > { %v1268_v47 = vpop.permute.xlu0 %1267 }
 0xd45   : > { %v1273_v48 = vsel %vm635_vm5, %v1268_v47, 0 }
 0xd46   : > { %2143 = vmatpush3.bf16.msra.mxu1 %v1273_v48 }
 0xd47   : > { %2148 = vmatprep.subr.bf16.mxu1 %v2371_v8 }
 0xd4e   : > { %v2302_v49 = vpop.eup %2301 }
 0xd4f   : > { %v1265_v50 = vmul.f32 %v2302_v49, %v2300_v44  ;;  %v2278_v44 = vld [vmem:[%s2852_s10 + $0x60] sm:$0xff]  }
 0xd51   : > { %v1266_v52 = vpack.c.bf16 %v1265_v50, %v1265_v50 }
 0xd53   : > { %2145 = vmatmul.mubr.msk.bf16.vlgmr.msra.gmra.mxu1 %vm617_vm4, %v1266_v52 }
 0xd54   : > { %2149 = vmatpush3.bf16.xpose.msra.mxu1 %v1324_v53  ;;  %2150 = vmatprep.mubr.msk.bf16.mxu1 %vm2372_vm1, %v2371_v8  ;;  %v1955_v53 = vld [vmem:[%s2849_s7 + $0x1] ss:$0 sm:$0xff] }
 0xd55   : > { %2160 = vmatprep.subr.bf16.mxu1 %v2371_v8 }
 0xd5b   : > { %2151 = vmatmul.mubr.msk.bf16.vlgmr.msra.gmra.mxu1 %vm570_vm2, %v1317_v54 }
 0xd5c   : > { %2162 = vmatprep.mubr.msk.bf16.mxu1 %vm2372_vm1, %v2371_v8  ;;  %2161 = vmatpush3.bf16.msra.mxu1 %v2272_v10 }
 0xd5d   : > { %2172 = vmatprep.subr.bf16.mxu1 %v2371_v8 }
 0xe13   : > { %v1309_v55 = vpop.f32.mrf.mxu1 }
 0xe14   : > { %v1315_v16 = vpack.c.bf16 %v1309_v55, %v1309_v55 }
 0xe15   : > { %v2146_v56 = vpop.f32.mrf.mxu1 }
 0xe17   : > { %v1312_v57 = vpop.f32.mrf.mxu1 }
 0xe18   : > { %v2281_v57 = vld [vmem:[%s2852_s10 + $0x48] sm:$0xff]  }
 0xe19   : > { %v2147_v58 = vpop.f32.mrf.mxu1 }
 0xe1a   : > { %v2282_v58 = vld [vmem:[%s2852_s10 + $0x40] sm:$0xff]  }
 0xe1b   : > { %v1360_v59 = vpop.f32.mrf.mxu1 }
 0xe1c   : > { %v1361_v60 = vadd.f32 %v1360_v59, %v2550_v34  ;;  %v1961_v59 = vld [vmem:[%s2851_s9 + $0x1] ss:$0 sm:$0xff] }
 0xe1d   : > { %v2152_v61 = vpop.f32.mrf.mxu1 }
 0xe1e   : > { %v1366_v62 = vsel %vm617_vm4, %v1361_v60, -inf }
 0xe1f   : > { %1367 = vmax.xlane.f32.xlu1 %v1366_v62  ;;  %v1363_v63 = vpop.f32.mrf.mxu1 }
 0xe21   : > { %v2153_v1 = vpop.f32.mrf.mxu1 }
 0xe30   : > { %1378 = vrot.lane.b32.xlu1 %v1200_v29, %s2876_s18  ;;  %s1896_s18 = sshll.u32 %s456_s26, 3 }
 0xe31   : > { %s458_s21 = scalar_lea.vmem [#allocation2], %s1896_s18  ;;  %s2313_s18 = sshll.u32 %s2379_s17, 4  ;;  %s2314_s18 = int_to_ptr.vmem [resolvable:$false] %s2313_s18 }
 0xe32   : > { %s1833_s0 = sshll.u32 %s458_s21, 4  ;;  %s2315_s1 = scalar_lea.vmem %s2314_s18, 256  ;;  %s2803_s0 = int_to_ptr.vmem [resolvable:$true] %s1833_s0 }
 0xe33   : > { %s2309_s27 = scalar_lea.vmem %s2803_s0, 128  ;;  %p2316_p0 = scmp.lt.s32.totalorder %s2803_s0, %s2314_s18 }
 0xe34   : > { %p2310_p11 = scmp.ne.s32.totalorder %s2803_s0, %s2309_s27  ;;  %p2317_p1 = scmp.lt.s32.totalorder %s2315_s1, %s2309_s27 }
 0xe36   : > { %p2311_p12 = pnand %p2310_p11, %p2493_p5  ;;  %p2318_p2 = por %p2317_p1, %p2316_p0 }
 0xe38   : > { %p2312_p13 = pneg %p2311_p12 }
 0xe3a   : > { %p2319_p3 = pnand %p2318_p2, %p2312_p13 }
 0xea8   : > { %v1368_v2 = vpop.xlane.xlu1 %1367 }
 0xea9   : > { %v1369_v3 = vsub.f32 %v1361_v60, %v1368_v2 }
 0xeab   : > { %v1370_v4 = vmul.f32 1.442695, %v1369_v3 }
 0xeac   : > { %v1379_v5 = vpop.permute.xlu1 %1378 }
 0xead   : > { %2303 = vpow2.f32 %v1370_v4  ;;  %v1384_v7 = vsel %vm635_vm5, %v1379_v5, 0  ;;  %v2283_v4 = vld [vmem:[%s2854_s12 + $0x8] sm:$0xff]   ;;  %v2284_v5 = vld [vmem:[%s2854_s12] sm:$0xff]  }
 0xeae   : > { %2155 = vmatpush3.bf16.msra.mxu0 %v1384_v7  ;;  %v1982_v7 = vld [vmem:[%s2853_s11 + $0x1] ss:$0 sm:$0xff] }
 0xeaf   : > { %2166 = vmatprep.subr.bf16.mxu0 %v2371_v8 }
 0xeba   : > { %v2304_v9 = vpop.eup %2303 }
 0xebb   : > { %v1372_v34 = vsel %vm617_vm4, %v2304_v9, 0.0 }
 0xebc   : > { %1373 = vadd.xlane.f32.xlu0 %v1372_v34 }
 0xf45   : > { %v1374_v11 = vpop.xlane.xlu0 %1373 }
 0xf46   : > { %2305 = vrcp.f32 %v1374_v11 }
 0xf53   : > { %v2306_v12 = vpop.eup %2305 }
 0xf54   : > { %v1376_v13 = vmul.f32 %v2306_v12, %v2304_v9 }
 0xf56   : > { %v1377_v15 = vpack.c.bf16 %v1376_v13, %v1376_v13 }
 0xf58   : > { %2157 = vmatmul.mubr.msk.bf16.vlgmr.msra.gmra.mxu0 %vm617_vm4, %v1377_v15 }
 0xf59   : > { %2167 = vmatpush3.bf16.msra.mxu0 %v2271_v14  ;;  %2168 = vmatprep.mubr.msk.bf16.mxu0 %vm2372_vm1, %v2371_v8 }
 0xf5a   : > { %2180 = vmatprep.subr.bf16.mxu0 %v2371_v8 }
 0xf60   : > { %2169 = vmatmul.mubr.msk.bf16.vlgmr.msra.gmra.mxu0 %vm570_vm2, %v1315_v16 }
 0xf61   : > { %2196 = vmatprep.mubr.msk.bf16.mxu0 %vm2372_vm1, %v2371_v8  ;;  %2181 = vmatpush3.bf16.msra.mxu0 %v2275_v41 }
 0xf62   : > { %2182 = vmatprep.subr.bf16.mxu0 %v2371_v8 }
 0xf65   : > { %2183 = vmatpush3.bf16.msra.mxu0 %v2276_v42 }
 0xf66   : > { %2184 = vmatprep.subr.bf16.mxu0 %v2371_v8 }
 0xf69   : > { %2185 = vmatpush3.bf16.msra.mxu0 %v2277_v43 }
 0xf6a   : > { %2186 = vmatprep.subr.bf16.mxu0 %v2371_v8 }
 0xf6d   : > { %2187 = vmatpush3.bf16.msra.mxu0 %v2278_v44 }
 0xf6e   : > { %2188 = vmatprep.subr.bf16.mxu0 %v2371_v8 }
 0xf71   : > { %2189 = vmatpush3.bf16.msra.mxu0 %v2279_v45 }
 0xf72   : > { %2190 = vmatprep.subr.bf16.mxu0 %v2371_v8 }
 0xf75   : > { %2191 = vmatpush3.bf16.msra.mxu0 %v2280_v46 }
 0xf76   : > { %2192 = vmatprep.subr.bf16.mxu0 %v2371_v8 }
 0xf79   : > { %2193 = vmatpush3.bf16.msra.mxu0 %v2281_v57 }
 0xf7a   : > { %2194 = vmatprep.subr.bf16.mxu0 %v2371_v8 }
 0xf7d   : > { %2195 = vmatpush3.bf16.msra.mxu0 %v2282_v58 }
0x1018   : > { %v1420_v17 = vpop.f32.mrf.mxu0 }
0x1019   : > { %v1426_v18 = vpack.c.bf16 %v1420_v17, %v1420_v17 }
0x101a   : > { %v2158_v19 = vpop.f32.mrf.mxu0 }
0x101b   : > { %2163 = vmatmul.mubr.msk.bf16.vlgmr.msra.gmra.mxu1 %vm570_vm2, %v1426_v18 }
0x101c   : > { %v1423_v20 = vpop.f32.mrf.mxu0  ;;  %2176 = vmatprep.mubr.msk.bf16.mxu1 %vm2372_vm1, %v2371_v8 }
0x101e   : > { %v2159_v21 = vpop.f32.mrf.mxu0 }
0x1020   : > { %v1519_v22 = vpop.f32.mrf.mxu0 }
0x1022   : > { %v2170_v23 = vpop.f32.mrf.mxu0 }
0x1024   : > { %v1522_v24 = vpop.f32.mrf.mxu0 }
0x1026   : > { %v2171_v25 = vpop.f32.mrf.mxu0 }
0x10db   : > { %v1470_v26 = vpop.f32.mrf.mxu1 }
0x10dc   : > { %v1520_v27 = vadd.f32 %v1519_v22, %v1470_v26 }
0x10dd   : > { %v2164_v29 = vpop.f32.mrf.mxu1 }
0x10de   : > { %v1525_v30 = vadd.f32 %v1520_v27, %v2652_v6  ;;  %v2273_v6 = vld [vmem:[%s2850_s8 + $0x18] sm:$0xff]  }
0x10df   : > { %v1473_v31 = vpop.f32.mrf.mxu1  ;;  %2173 = vmatpush3.bf16.msra.mxu1 %v2273_v6 }
0x10e0   : > { %v2724_v32 = vadd.f32 %v1951_v28, %v1525_v30  ;;  %2174 = vmatprep.subr.bf16.mxu1 %v2371_v8 }
0x10e1   : > { %v2165_v33 = vpop.f32.mrf.mxu1 }
0x10e2   : > { %v1539_v35 = vsel %vm473_vm0, %v2724_v32, 0.0 }
0x10e3   : > { %1540 = vadd.xlane.f32.xlu0 %v1539_v35  ;;  %2175 = vmatpush3.bf16.msra.mxu1 %v2274_v40 }
0x10e4   : > { %2200 = vmatprep.subr.bf16.mxu1 %v2371_v8 }
0x116c   : > { %v1541_v36 = vpop.xlane.xlu0 %1540 }
0x116d   : > { %v1542_v37 = vmul.f32 0.03125, %v1541_v36 }
0x116f   : > { %v1543_v0 = vsub.f32 %v2724_v32, %v1542_v37 }
0x1171   : > { %v1544_v38 = vmul.f32 %v1543_v0, %v1543_v0 }
0x1173   : > { %v1545_v39 = vsel %vm473_vm0, %v1544_v38, 0.0 }
0x1174   : > { %1546 = vadd.xlane.f32.xlu0 %v1545_v39 }
0x11fd   : > { %v1547_v47 = vpop.xlane.xlu0 %1546 }
0x11fe   : > { %v1548_v48 = vmul.f32 0.03125, %v1547_v47 }
0x1200   : > { %v1549_v49 = vadd.f32 1e-05, %v1548_v48 }
0x1202   : > { %2307 = vrsqrt.f32 %v1549_v49 }
0x120f   : > { %v2308_v50 = vpop.eup %2307 }
0x1210   : > { %v1551_v52 = vmul.f32 %v2308_v50, %v1543_v0 }
0x1212   : > { %v1558_v54 = vmul.f32 %v1954_v51, %v1551_v52 }
0x1214   : > { %v1565_v55 = vadd.f32 %v1955_v53, %v1558_v54 }
0x1216   : > { %v1566_v56 = vpack.c.bf16 %v1565_v55, %v1565_v55 }
0x1218   : > { %2177 = vmatmul.mubr.msk.bf16.vlgmr.msra.gmra.mxu1 %vm473_vm0, %v1566_v56 }
0x1219   : > { %2204 = vmatprep.mubr.msk.bf16.mxu1 %vm2372_vm1, %v2371_v8  ;;  %2201 = vmatpush3.bf16.msra.mxu1 %v2283_v4 }
0x121a   : > { %2202 = vmatprep.subr.bf16.mxu1 %v2371_v8  ;;  %v1991_v8 = vld [vmem:[%s2855_s13] ss:$0 sm:$0xff] }
0x121d   : > { %2203 = vmatpush3.bf16.msra.mxu1 %v2284_v5 }
0x12d8   : > { %v1629_v60 = vpop.f32.mrf.mxu1 }
0x12d9   : > { %v1630_v61 = vadd.f32 %v1961_v59, %v1629_v60 }
0x12da   : > { %v2178_v62 = vpop.f32.mrf.mxu1 }
0x12db   : > { %v1635_v63 = vmax.f32 %v1630_v61, 0.0 }
0x12dc   : > { %v1632_v1 = vpop.f32.mrf.mxu1 }
0x12dd   : > { %v1636_v2 = vpack.c.bf16 %v1635_v63, %v1635_v63 }
0x12de   : > { %v2179_v3 = vpop.f32.mrf.mxu1 }
0x12df   : > { %2197 = vmatmul.mubr.bf16.vlgmr.msra.gmra.mxu0 %v1636_v2 }
0x139f   : > { %v1744_v9 = vpop.f32.mrf.mxu0 }
0x13a0   : > { %v1745_v34 = vadd.f32 %v1982_v7, %v1744_v9 }
0x13a1   : > { %v2198_v10 = vpop.f32.mrf.mxu0 }
0x13a2   : > { %v1750_v11 = vadd.f32 %v1745_v34, %v2724_v32 }
0x13a3   : > { %v1747_v12 = vpop.f32.mrf.mxu0 }
0x13a4   : > { %v1751_v13 = vpack.c.bf16 %v1750_v11, %v1750_v11 }
0x13a5   : > { %v2199_v14 = vpop.f32.mrf.mxu0 }
0x13a6   : > { %2205 = vmatmul.mubr.msk.bf16.vlgmr.msra.gmra.mxu1 %vm473_vm0, %v1751_v13 }
0x1466   : > { %v1812_v15 = vpop.f32.mrf.mxu1 }
0x1467   : > { %v1813_v16 = vadd.f32 %v1991_v8, %v1812_v15 }
0x1468   : > { %v2206_v17 = vpop.f32.mrf.mxu1 }
0x1469   : > { %1818 = vst [vmem:[%s458_s21] sm:$0xff] %v1813_v16 }
0x146a   : > { %v1815_v18 = vpop.f32.mrf.mxu1 }
0x146b   : > { %2322 = shalt.err (!%p2319_p3)
}
0x146c   : > { %s2323_s28 = scalar_lea.hbm %s2801_s2, 128  ;;  %s2327_s25 = scalar_lea.hbm %s2856_s14, 256 }
0x146d   : > { %p2324_p4 = scmp.ne.s32.totalorder %s2801_s2, %s2323_s28  ;;  %p2328_p9 = scmp.lt.s32.totalorder %s2801_s2, %s2856_s14 }
0x146e   : > { %p2329_p10 = scmp.lt.s32.totalorder %s2327_s25, %s2323_s28 }
0x146f   : > { %p2325_p7 = pnand %p2324_p4, %p2493_p5 }
0x1470   : > { %p2330_p11 = por %p2329_p10, %p2328_p9 }
0x1471   : > { %p2326_p8 = pneg %p2325_p7 }
0x1473   : > { %p2331_p12 = pnand %p2330_p11, %p2326_p8 }
0x1475   : > { %2334 = shalt.err (!%p2331_p12)
}
0x1476   : > { %2208 = dma.vmem_to_hbm [thread:$0]  (%p2493_p5), %s2803_s0, 128, %s2801_s2, %s1820_s20   ;;  %v2207_v19 = vpop.f32.mrf.mxu1 }
0x1477 PF: > { %p2214_p13 = scmp.ge.s32.totalorder %s2369_s16, 2  ;;  %s1845_s27 = sand.u32 1, %s2357_s29  }
0x1478   : > { %s1846_s3 = scalar_lea.sflag [#allocation3], %s1845_s27 }
0x1479   : > { %p2211_p0 = pnand %p2214_p13, %p2497_p6 }
0x147b   : > { %p2212_p1 = pneg %p2211_p0 }
0x147d   : > { %2352 = dma.done.wait (%p2212_p1), %s1846_s3, 128  }
0x147e   : > { %2354 = vsyncadd (%p2212_p1), %s1846_s3, 4294967168  ;;  %p24_p2 = scmp.ge.s32.totalorder %s2480_s19, 4   ;;  %s2877_s29 = smov %s2361_s30 }
0x147f   : > { %s2878_s30 = smov %s2365_s15  ;;  %s2879_s15 = smov %s2491_s22 }
0x1480   : > { %s2880_s16 = smov %s2480_s19  ;;  %26 = sbr.rel (!%p24_p2) target bundleno = 8 (0x8), region = 122 }
0x1485   :  { %1851 = vsyncpa [#allocation3], 1 }
0x1486   :  { %1853 = vsyncpa [#allocation3 + $0x1], 1 }

</bundles_post_ra>
